<compile_context>
chip_gen: v7x
topology: tpu7x:2x2x1
jax: 0.10.0
libtpu: 0.0.40
codegen_flags: <defaults>
</compile_context>

<pallas_src>
import math

import jax
import jax.numpy as jnp
from jax import lax
from jax.experimental import pallas as pl
from jax.experimental.pallas import tpu as pltpu

# ----------------------------- model config ---------------------------------
NUM_LAYERS = 2
D_MODEL    = 32
NUM_HEADS  = 4
HEAD_DIM   = D_MODEL // NUM_HEADS
D_FF       = 64
EPS        = 1e-6
NEG_INF    = -1e9

BATCH   = 2
SEQ_LEN = 8


# ----------------------------- Pallas kernel ---------------------------------
def _layer_norm(h, gamma, beta):
    """LayerNorm over the last axis (biased variance, like nn.LayerNorm)."""
    mu = jnp.mean(h, axis=-1, keepdims=True)
    var = jnp.mean((h - mu) ** 2, axis=-1, keepdims=True)
    return (h - mu) * lax.rsqrt(var + EPS) * gamma + beta


def fused_encoder_kernel(
    x_ref, mask_ref,
    lnp_ref, wqkv_ref, bqkv_ref, wo_ref, bo_ref,
    w1_ref, c1_ref, w2_ref, c2_ref, lnf_ref,
    o_ref,
):
    """Single invocation (no grid).  Everything lives in VMEM; layers and batch
    elements are iterated with static Python loops (fully unrolled)."""
    B, S, D, H, Hd = BATCH, SEQ_LEN, D_MODEL, NUM_HEADS, HEAD_DIM
    scale = jnp.float32(1.0 / math.sqrt(Hd))

    x = x_ref[...]                                     # (B*S, D)

    # Hoisted additive attention bias: 0 for keep, -1e9 for padded keys.
    mask = mask_ref[...]                               # (B, S) float
    bias = jnp.where(mask > 0.5, jnp.float32(0.0), jnp.float32(NEG_INF))
    bias_b = [bias[b].reshape(1, 1, S) for b in range(B)]   # per-batch (1,1,S)

    for l in range(NUM_LAYERS):                        # static, unrolled
        lnp = lnp_ref[l]                               # (4, D): g1,b1,g2,b2
        g1, b1, g2, b2 = lnp[0:1], lnp[1:2], lnp[2:3], lnp[3:4]

        # --- self-attention sublayer (pre-LN) --------------------------------
        x1 = _layer_norm(x, g1, b1)
        qkv = jnp.dot(x1, wqkv_ref[l],
                      preferred_element_type=jnp.float32) + bqkv_ref[l]   # (B*S, 3D)
        q = qkv[:, 0:D]
        k = qkv[:, D:2 * D]
        v = qkv[:, 2 * D:3 * D]

        ctx = []
        for b in range(B):                             # static, unrolled
            qb = q[b * S:(b + 1) * S].reshape(S, H, Hd)
            kb = k[b * S:(b + 1) * S].reshape(S, H, Hd)
            vb = v[b * S:(b + 1) * S].reshape(S, H, Hd)

            s = jnp.einsum("qhd,khd->hqk", qb, kb,
                           preferred_element_type=jnp.float32) * scale
            s = s + bias_b[b]                                          # (H,S,S)

            m = jnp.max(s, axis=-1, keepdims=True)
            p = jnp.exp(s - m)
            p = p * pl.reciprocal(jnp.sum(p, axis=-1, keepdims=True), approx=True)

            cb = jnp.einsum("hqk,khd->qhd", p, vb,
                            preferred_element_type=jnp.float32)        # (S,H,Hd)
            ctx.append(cb.reshape(S, D))

        attn = jnp.concatenate(ctx, axis=0)                            # (B*S, D)
        attn = jnp.dot(attn, wo_ref[l],
                       preferred_element_type=jnp.float32) + bo_ref[l]
        x = x + attn                                   # residual (dropout = id)

        # --- feed-forward sublayer (pre-LN) ----------------------------------
        x2 = _layer_norm(x, g2, b2)
        hid = jnp.dot(x2, w1_ref[l],
                      preferred_element_type=jnp.float32) + c1_ref[l]
        hid = jnp.maximum(hid, 0.0)
        ff = jnp.dot(hid, w2_ref[l],
                     preferred_element_type=jnp.float32) + c2_ref[l]
        x = x + ff                                     # residual (dropout = id)

    # Final LayerNorm + single lane-contiguous store.
    lnf = lnf_ref[...]                                 # (2, D): gf, bf
    o_ref[...] = _layer_norm(x, lnf[0:1], lnf[1:2])


# ----------------------------- wrapper ----------------------------------------
@jax.jit
def encoder_forward(x, e_mask, params):
    """params: dict with 'layers' (list of per-layer dicts) and 'ln' (gamma, beta)."""
    B, S, D = x.shape
    layers = params["layers"]

    def stack(name):
        return jnp.stack([lp[name] for lp in layers], axis=0)

    # Pack weights into a few lane-dense, layer-stacked slabs.
    lnp = jnp.stack(
        [jnp.concatenate([lp["g1"], lp["b1"], lp["g2"], lp["b2"]], axis=0)
         for lp in layers], axis=0)                                   # (L, 4, D)
    wqkv = jnp.concatenate([stack("wq"), stack("wk"), stack("wv")], axis=-1)  # (L, D, 3D)
    bqkv = jnp.concatenate([stack("bq"), stack("bk"), stack("bv")], axis=-1)  # (L, 1, 3D)
    wo, bo = stack("wo"), stack("bo")                                 # (L, D, D), (L, 1, D)
    w1, c1 = stack("w1"), stack("c1")                                 # (L, D, F), (L, 1, F)
    w2, c2 = stack("w2"), stack("c2")                                 # (L, F, D), (L, 1, D)
    lnf = jnp.concatenate(params["ln"], axis=0)                       # (2, D)

    x2d = x.reshape(B * S, D)
    mask_f = e_mask.reshape(B, S).astype(jnp.float32)

    vmem = pl.BlockSpec(memory_space=pltpu.MemorySpace.VMEM)
    operands = (x2d, mask_f, lnp, wqkv, bqkv, wo, bo, w1, c1, w2, c2, lnf)

    out2d = pl.pallas_call(
        fused_encoder_kernel,
        out_shape=jax.ShapeDtypeStruct((B * S, D), jnp.float32),
        in_specs=[vmem] * len(operands),
        out_specs=vmem,
    )(*operands)
    return out2d.reshape(B, S, D)


# ----------------------------- reference (plain JAX) -------------------------
def _ref_layer_norm(h, g, b):
    mu = jnp.mean(h, axis=-1, keepdims=True)
    var = jnp.mean((h - mu) ** 2, axis=-1, keepdims=True)
    return (h - mu) / jnp.sqrt(var + EPS) * g + b


def encoder_reference(x, e_mask, params):
    B, S, D = x.shape
    mask = e_mask[:, :, None, :]             # (B, 1, 1, S)
    for lp in params["layers"]:
        x1 = _ref_layer_norm(x, lp["g1"], lp["b1"])
        q = x1 @ lp["wq"] + lp["bq"]
        k = x1 @ lp["wk"] + lp["bk"]
        v = x1 @ lp["wv"] + lp["bv"]
        q = q.reshape(B, S, NUM_HEADS, HEAD_DIM).transpose(0, 2, 1, 3)
        k = k.reshape(B, S, NUM_HEADS, HEAD_DIM).transpose(0, 2, 1, 3)
        v = v.reshape(B, S, NUM_HEADS, HEAD_DIM).transpose(0, 2, 1, 3)
        s = jnp.einsum("bhqd,bhkd->bhqk", q, k) / math.sqrt(HEAD_DIM)
        s = jnp.where(mask, s, NEG_INF)
        p = jax.nn.softmax(s, axis=-1)
        a = jnp.einsum("bhqk,bhkd->bhqd", p, v).transpose(0, 2, 1, 3).reshape(B, S, D)
        x = x + (a @ lp["wo"] + lp["bo"])
        x2 = _ref_layer_norm(x, lp["g2"], lp["b2"])
        ff = jax.nn.relu(x2 @ lp["w1"] + lp["c1"]) @ lp["w2"] + lp["c2"]
        x = x + ff
    g, b = params["ln"]
    return _ref_layer_norm(x, g, b)


# ----------------------------- param init ------------------------------------
def init_params(key):
    def dense(k, fan_in, fan_out):
        kw, kb = jax.random.split(k)
        w = jax.random.normal(kw, (fan_in, fan_out), jnp.float32) * (1.0 / math.sqrt(fan_in))
        b = jax.random.normal(kb, (1, fan_out), jnp.float32) * 0.01
        return w, b

    layers = []
    for _ in range(NUM_LAYERS):
        key, k1, k2, k3, k4, k5, k6 = jax.random.split(key, 7)
        wq, bq = dense(k1, D_MODEL, D_MODEL)
        wk, bk = dense(k2, D_MODEL, D_MODEL)
        wv, bv = dense(k3, D_MODEL, D_MODEL)
        wo, bo = dense(k4, D_MODEL, D_MODEL)
        w1, c1 = dense(k5, D_MODEL, D_FF)
        w2, c2 = dense(k6, D_FF, D_MODEL)
        layers.append(dict(
            g1=jnp.ones((1, D_MODEL), jnp.float32), b1=jnp.zeros((1, D_MODEL), jnp.float32),
            wq=wq, bq=bq, wk=wk, bk=bk, wv=wv, bv=bv, wo=wo, bo=bo,
            g2=jnp.ones((1, D_MODEL), jnp.float32), b2=jnp.zeros((1, D_MODEL), jnp.float32),
            w1=w1, c1=c1, w2=w2, c2=c2,
        ))
    ln = (jnp.ones((1, D_MODEL), jnp.float32), jnp.zeros((1, D_MODEL), jnp.float32))
    return dict(layers=layers, ln=ln)


# ----------------------------- main -------------------------------------------
if __name__ == "__main__":
    key = jax.random.PRNGKey(0)
    kx, kp = jax.random.split(key)

    x = jax.random.normal(kx, (BATCH, SEQ_LEN, D_MODEL), jnp.float32)
    # e_mask: (batch, 1, seq_len) boolean; seq 0 full length, seq 1 padded to 5
    lengths = jnp.array([SEQ_LEN, 5])
    e_mask = (jnp.arange(SEQ_LEN)[None, None, :] < lengths[:, None, None])

    params = init_params(kp)

    out = encoder_forward(x, e_mask, params)
    out = jax.block_until_ready(out)

    ref = encoder_reference(x, e_mask, params)
    max_err = float(jnp.max(jnp.abs(out - ref)))
    assert out.shape == (BATCH, SEQ_LEN, D_MODEL)
    assert max_err < 2e-2, f"mismatch vs reference: {max_err}"

    print("KERNEL_OK")
</pallas_src>

<mosaic_0001>
module attributes {stable_mosaic.version = 11 : i64} {
  func.func @fused_encoder_kernel(%arg0: memref<16x32xf32, #tpu.memory_space<vmem>>, %arg1: memref<2x8xf32, #tpu.memory_space<vmem>>, %arg2: memref<2x4x32xf32, #tpu.memory_space<vmem>>, %arg3: memref<2x32x96xf32, #tpu.memory_space<vmem>>, %arg4: memref<2x1x96xf32, #tpu.memory_space<vmem>>, %arg5: memref<2x32x32xf32, #tpu.memory_space<vmem>>, %arg6: memref<2x1x32xf32, #tpu.memory_space<vmem>>, %arg7: memref<2x32x64xf32, #tpu.memory_space<vmem>>, %arg8: memref<2x1x64xf32, #tpu.memory_space<vmem>>, %arg9: memref<2x64x32xf32, #tpu.memory_space<vmem>>, %arg10: memref<2x1x32xf32, #tpu.memory_space<vmem>>, %arg11: memref<2x32xf32, #tpu.memory_space<vmem>>, %arg12: memref<16x32xf32, #tpu.memory_space<vmem>>) attributes {dimension_semantics = [], scalar_prefetch = 0 : i64, scratch_operands = 0 : i64, tpu.core_type = #tpu.core_type<tc>} {
    %c0 = arith.constant 0 : index
    %c0_0 = arith.constant 0 : index
    %0 = vector.load %arg0[%c0, %c0_0] : memref<16x32xf32, #tpu.memory_space<vmem>>, vector<16x32xf32>
    %c0_1 = arith.constant 0 : index
    %c0_2 = arith.constant 0 : index
    %1 = vector.load %arg1[%c0_1, %c0_2] : memref<2x8xf32, #tpu.memory_space<vmem>>, vector<2x8xf32>
    %cst = arith.constant 5.000000e-01 : f32
    %2 = vector.broadcast %cst : f32 to vector<2x8xf32>
    %3 = arith.cmpf ogt, %1, %2 : vector<2x8xf32>
    %cst_3 = arith.constant 0.000000e+00 : f32
    %cst_4 = arith.constant -1.000000e+09 : f32
    %4 = vector.broadcast %cst_3 : f32 to vector<2x8xf32>
    %5 = vector.broadcast %cst_4 : f32 to vector<2x8xf32>
    %6 = arith.select %3, %4, %5 : vector<2x8xi1>, vector<2x8xf32>
    %7 = vector.extract_strided_slice %6 {offsets = [0, 0], sizes = [1, 8], strides = [1, 1]} : vector<2x8xf32> to vector<1x8xf32>
    %8 = vector.shape_cast %7 : vector<1x8xf32> to vector<8xf32>
    %9 = vector.shape_cast %8 : vector<8xf32> to vector<1x1x8xf32>
    %10 = vector.extract_strided_slice %6 {offsets = [1, 0], sizes = [1, 8], strides = [1, 1]} : vector<2x8xf32> to vector<1x8xf32>
    %11 = vector.shape_cast %10 : vector<1x8xf32> to vector<8xf32>
    %12 = vector.shape_cast %11 : vector<8xf32> to vector<1x1x8xf32>
    %c0_5 = arith.constant 0 : index
    %c0_6 = arith.constant 0 : index
    %c0_7 = arith.constant 0 : index
    %13 = vector.load %arg2[%c0_5, %c0_6, %c0_7] : memref<2x4x32xf32, #tpu.memory_space<vmem>>, vector<1x4x32xf32>
    %14 = vector.shape_cast %13 : vector<1x4x32xf32> to vector<4x32xf32>
    %15 = vector.extract_strided_slice %14 {offsets = [0, 0], sizes = [1, 32], strides = [1, 1]} : vector<4x32xf32> to vector<1x32xf32>
    %16 = vector.extract_strided_slice %14 {offsets = [1, 0], sizes = [1, 32], strides = [1, 1]} : vector<4x32xf32> to vector<1x32xf32>
    %17 = vector.extract_strided_slice %14 {offsets = [2, 0], sizes = [1, 32], strides = [1, 1]} : vector<4x32xf32> to vector<1x32xf32>
    %18 = vector.extract_strided_slice %14 {offsets = [3, 0], sizes = [1, 32], strides = [1, 1]} : vector<4x32xf32> to vector<1x32xf32>
    %cst_8 = arith.constant dense<0.000000e+00> : vector<16xf32>
    %19 = vector.multi_reduction <add>, %0, %cst_8 [1] : vector<16x32xf32> to vector<16xf32>
    %20 = vector.shape_cast %19 : vector<16xf32> to vector<16x1xf32>
    %cst_9 = arith.constant 3.200000e+01 : f32
    %21 = vector.broadcast %cst_9 : f32 to vector<16x1xf32>
    %22 = arith.divf %20, %21 : vector<16x1xf32>
    %23 = vector.broadcast %22 : vector<16x1xf32> to vector<16x32xf32>
    %24 = arith.subf %0, %23 : vector<16x32xf32>
    %25 = arith.mulf %24, %24 : vector<16x32xf32>
    %cst_10 = arith.constant dense<0.000000e+00> : vector<16xf32>
    %26 = vector.multi_reduction <add>, %25, %cst_10 [1] : vector<16x32xf32> to vector<16xf32>
    %27 = vector.shape_cast %26 : vector<16xf32> to vector<16x1xf32>
    %cst_11 = arith.constant 3.200000e+01 : f32
    %28 = vector.broadcast %cst_11 : f32 to vector<16x1xf32>
    %29 = arith.divf %27, %28 : vector<16x1xf32>
    %30 = vector.broadcast %22 : vector<16x1xf32> to vector<16x32xf32>
    %31 = arith.subf %0, %30 : vector<16x32xf32>
    %cst_12 = arith.constant 9.99999997E-7 : f32
    %32 = vector.broadcast %cst_12 : f32 to vector<16x1xf32>
    %33 = arith.addf %29, %32 : vector<16x1xf32>
    %34 = math.rsqrt %33 : vector<16x1xf32>
    %35 = vector.broadcast %34 : vector<16x1xf32> to vector<16x32xf32>
    %36 = arith.mulf %31, %35 : vector<16x32xf32>
    %37 = vector.broadcast %15 : vector<1x32xf32> to vector<16x32xf32>
    %38 = arith.mulf %36, %37 : vector<16x32xf32>
    %39 = vector.broadcast %16 : vector<1x32xf32> to vector<16x32xf32>
    %40 = arith.addf %38, %39 : vector<16x32xf32>
    %c0_13 = arith.constant 0 : index
    %c0_14 = arith.constant 0 : index
    %c0_15 = arith.constant 0 : index
    %41 = vector.load %arg3[%c0_13, %c0_14, %c0_15] : memref<2x32x96xf32, #tpu.memory_space<vmem>>, vector<1x32x96xf32>
    %42 = vector.shape_cast %41 : vector<1x32x96xf32> to vector<32x96xf32>
    %cst_16 = arith.constant dense<0.000000e+00> : vector<16x96xf32>
    %43 = tpu.matmul %40, %42, %cst_16 {dimension_numbers = #tpu.dot_dimension_numbers<[1], [0], [0], [1], [0, 0, 1, 1], [], []>} : vector<16x32xf32>, vector<32x96xf32>, vector<16x96xf32> -> vector<16x96xf32>
    %c0_17 = arith.constant 0 : index
    %c0_18 = arith.constant 0 : index
    %c0_19 = arith.constant 0 : index
    %44 = vector.load %arg4[%c0_17, %c0_18, %c0_19] : memref<2x1x96xf32, #tpu.memory_space<vmem>>, vector<1x1x96xf32>
    %45 = vector.shape_cast %44 : vector<1x1x96xf32> to vector<1x96xf32>
    %46 = vector.broadcast %45 : vector<1x96xf32> to vector<16x96xf32>
    %47 = arith.addf %43, %46 : vector<16x96xf32>
    %48 = vector.extract_strided_slice %47 {offsets = [0, 0], sizes = [16, 32], strides = [1, 1]} : vector<16x96xf32> to vector<16x32xf32>
    %49 = vector.extract_strided_slice %47 {offsets = [0, 32], sizes = [16, 32], strides = [1, 1]} : vector<16x96xf32> to vector<16x32xf32>
    %50 = vector.extract_strided_slice %47 {offsets = [0, 64], sizes = [16, 32], strides = [1, 1]} : vector<16x96xf32> to vector<16x32xf32>
    %51 = vector.extract_strided_slice %48 {offsets = [0, 0], sizes = [8, 32], strides = [1, 1]} : vector<16x32xf32> to vector<8x32xf32>
    %52 = vector.shape_cast %51 : vector<8x32xf32> to vector<8x4x8xf32>
    %53 = vector.extract_strided_slice %49 {offsets = [0, 0], sizes = [8, 32], strides = [1, 1]} : vector<16x32xf32> to vector<8x32xf32>
    %54 = vector.shape_cast %53 : vector<8x32xf32> to vector<8x4x8xf32>
    %55 = vector.extract_strided_slice %50 {offsets = [0, 0], sizes = [8, 32], strides = [1, 1]} : vector<16x32xf32> to vector<8x32xf32>
    %56 = vector.shape_cast %55 : vector<8x32xf32> to vector<8x4x8xf32>
    "tpu.trace_start"() <{level = 10 : i32, message = "qhd,khd->hqk"}> : () -> ()
    %cst_20 = arith.constant dense<0.000000e+00> : vector<4x8x8xf32>
    %57 = tpu.matmul %52, %54, %cst_20 {dimension_numbers = #tpu.dot_dimension_numbers<[2], [2], [0], [0], [0, 1, 0, 0, 1, 0], [1], [1]>} : vector<8x4x8xf32>, vector<8x4x8xf32>, vector<4x8x8xf32> -> vector<4x8x8xf32>
    "tpu.trace_stop"() : () -> ()
    %cst_21 = arith.constant 0.353553385 : f32
    %58 = vector.broadcast %cst_21 : f32 to vector<4x8x8xf32>
    %59 = arith.mulf %57, %58 : vector<4x8x8xf32>
    %60 = vector.broadcast %9 : vector<1x1x8xf32> to vector<4x8x8xf32>
    %61 = arith.addf %59, %60 : vector<4x8x8xf32>
    %cst_22 = arith.constant dense<0xFF800000> : vector<4x8xf32>
    %62 = vector.multi_reduction <maximumf>, %61, %cst_22 [2] : vector<4x8x8xf32> to vector<4x8xf32>
    %63 = vector.shape_cast %62 : vector<4x8xf32> to vector<4x8x1xf32>
    %64 = vector.broadcast %63 : vector<4x8x1xf32> to vector<4x8x8xf32>
    %65 = arith.subf %61, %64 : vector<4x8x8xf32>
    %66 = math.exp %65 : vector<4x8x8xf32>
    %cst_23 = arith.constant dense<0.000000e+00> : vector<4x8xf32>
    %67 = vector.multi_reduction <add>, %66, %cst_23 [2] : vector<4x8x8xf32> to vector<4x8xf32>
    %68 = vector.shape_cast %67 : vector<4x8xf32> to vector<4x8x1xf32>
    %69 = tpu.reciprocal %68 {approx = true} : vector<4x8x1xf32> -> vector<4x8x1xf32>
    %70 = vector.broadcast %69 : vector<4x8x1xf32> to vector<4x8x8xf32>
    %71 = arith.mulf %66, %70 : vector<4x8x8xf32>
    "tpu.trace_start"() <{level = 10 : i32, message = "hqk,khd->qhd"}> : () -> ()
    %cst_24 = arith.constant dense<0.000000e+00> : vector<4x8x8xf32>
    %72 = tpu.matmul %56, %71, %cst_24 {dimension_numbers = #tpu.dot_dimension_numbers<[0], [2], [2], [1], [0, 1, 0, 2, 1, 1], [1], [0]>} : vector<8x4x8xf32>, vector<4x8x8xf32>, vector<4x8x8xf32> -> vector<4x8x8xf32>
    %73 = tpu.transpose %72, [2, 0, 1] : vector<4x8x8xf32> -> vector<8x4x8xf32>
    "tpu.trace_stop"() : () -> ()
    %74 = vector.shape_cast %73 : vector<8x4x8xf32> to vector<8x32xf32>
    %75 = vector.extract_strided_slice %48 {offsets = [8, 0], sizes = [8, 32], strides = [1, 1]} : vector<16x32xf32> to vector<8x32xf32>
    %76 = vector.shape_cast %75 : vector<8x32xf32> to vector<8x4x8xf32>
    %77 = vector.extract_strided_slice %49 {offsets = [8, 0], sizes = [8, 32], strides = [1, 1]} : vector<16x32xf32> to vector<8x32xf32>
    %78 = vector.shape_cast %77 : vector<8x32xf32> to vector<8x4x8xf32>
    %79 = vector.extract_strided_slice %50 {offsets = [8, 0], sizes = [8, 32], strides = [1, 1]} : vector<16x32xf32> to vector<8x32xf32>
    %80 = vector.shape_cast %79 : vector<8x32xf32> to vector<8x4x8xf32>
    "tpu.trace_start"() <{level = 10 : i32, message = "qhd,khd->hqk"}> : () -> ()
    %cst_25 = arith.constant dense<0.000000e+00> : vector<4x8x8xf32>
    %81 = tpu.matmul %76, %78, %cst_25 {dimension_numbers = #tpu.dot_dimension_numbers<[2], [2], [0], [0], [0, 1, 0, 0, 1, 0], [1], [1]>} : vector<8x4x8xf32>, vector<8x4x8xf32>, vector<4x8x8xf32> -> vector<4x8x8xf32>
    "tpu.trace_stop"() : () -> ()
    %cst_26 = arith.constant 0.353553385 : f32
    %82 = vector.broadcast %cst_26 : f32 to vector<4x8x8xf32>
    %83 = arith.mulf %81, %82 : vector<4x8x8xf32>
    %84 = vector.broadcast %12 : vector<1x1x8xf32> to vector<4x8x8xf32>
    %85 = arith.addf %83, %84 : vector<4x8x8xf32>
    %cst_27 = arith.constant dense<0xFF800000> : vector<4x8xf32>
    %86 = vector.multi_reduction <maximumf>, %85, %cst_27 [2] : vector<4x8x8xf32> to vector<4x8xf32>
    %87 = vector.shape_cast %86 : vector<4x8xf32> to vector<4x8x1xf32>
    %88 = vector.broadcast %87 : vector<4x8x1xf32> to vector<4x8x8xf32>
    %89 = arith.subf %85, %88 : vector<4x8x8xf32>
    %90 = math.exp %89 : vector<4x8x8xf32>
    %cst_28 = arith.constant dense<0.000000e+00> : vector<4x8xf32>
    %91 = vector.multi_reduction <add>, %90, %cst_28 [2] : vector<4x8x8xf32> to vector<4x8xf32>
    %92 = vector.shape_cast %91 : vector<4x8xf32> to vector<4x8x1xf32>
    %93 = tpu.reciprocal %92 {approx = true} : vector<4x8x1xf32> -> vector<4x8x1xf32>
    %94 = vector.broadcast %93 : vector<4x8x1xf32> to vector<4x8x8xf32>
    %95 = arith.mulf %90, %94 : vector<4x8x8xf32>
    "tpu.trace_start"() <{level = 10 : i32, message = "hqk,khd->qhd"}> : () -> ()
    %cst_29 = arith.constant dense<0.000000e+00> : vector<4x8x8xf32>
    %96 = tpu.matmul %80, %95, %cst_29 {dimension_numbers = #tpu.dot_dimension_numbers<[0], [2], [2], [1], [0, 1, 0, 2, 1, 1], [1], [0]>} : vector<8x4x8xf32>, vector<4x8x8xf32>, vector<4x8x8xf32> -> vector<4x8x8xf32>
    %97 = tpu.transpose %96, [2, 0, 1] : vector<4x8x8xf32> -> vector<8x4x8xf32>
    "tpu.trace_stop"() : () -> ()
    %98 = vector.shape_cast %97 : vector<8x4x8xf32> to vector<8x32xf32>
    %99 = tpu.concatenate %74, %98 in 0 : vector<8x32xf32>, vector<8x32xf32> -> vector<16x32xf32>
    %c0_30 = arith.constant 0 : index
    %c0_31 = arith.constant 0 : index
    %c0_32 = arith.constant 0 : index
    %100 = vector.load %arg5[%c0_30, %c0_31, %c0_32] : memref<2x32x32xf32, #tpu.memory_space<vmem>>, vector<1x32x32xf32>
    %101 = vector.shape_cast %100 : vector<1x32x32xf32> to vector<32x32xf32>
    %cst_33 = arith.constant dense<0.000000e+00> : vector<16x32xf32>
    %102 = tpu.matmul %99, %101, %cst_33 {dimension_numbers = #tpu.dot_dimension_numbers<[1], [0], [0], [1], [0, 0, 1, 1], [], []>} : vector<16x32xf32>, vector<32x32xf32>, vector<16x32xf32> -> vector<16x32xf32>
    %c0_34 = arith.constant 0 : index
    %c0_35 = arith.constant 0 : index
    %c0_36 = arith.constant 0 : index
    %103 = vector.load %arg6[%c0_34, %c0_35, %c0_36] : memref<2x1x32xf32, #tpu.memory_space<vmem>>, vector<1x1x32xf32>
    %104 = vector.shape_cast %103 : vector<1x1x32xf32> to vector<1x32xf32>
    %105 = vector.broadcast %104 : vector<1x32xf32> to vector<16x32xf32>
    %106 = arith.addf %102, %105 : vector<16x32xf32>
    %107 = arith.addf %0, %106 : vector<16x32xf32>
    %cst_37 = arith.constant dense<0.000000e+00> : vector<16xf32>
    %108 = vector.multi_reduction <add>, %107, %cst_37 [1] : vector<16x32xf32> to vector<16xf32>
    %109 = vector.shape_cast %108 : vector<16xf32> to vector<16x1xf32>
    %cst_38 = arith.constant 3.200000e+01 : f32
    %110 = vector.broadcast %cst_38 : f32 to vector<16x1xf32>
    %111 = arith.divf %109, %110 : vector<16x1xf32>
    %112 = vector.broadcast %111 : vector<16x1xf32> to vector<16x32xf32>
    %113 = arith.subf %107, %112 : vector<16x32xf32>
    %114 = arith.mulf %113, %113 : vector<16x32xf32>
    %cst_39 = arith.constant dense<0.000000e+00> : vector<16xf32>
    %115 = vector.multi_reduction <add>, %114, %cst_39 [1] : vector<16x32xf32> to vector<16xf32>
    %116 = vector.shape_cast %115 : vector<16xf32> to vector<16x1xf32>
    %cst_40 = arith.constant 3.200000e+01 : f32
    %117 = vector.broadcast %cst_40 : f32 to vector<16x1xf32>
    %118 = arith.divf %116, %117 : vector<16x1xf32>
    %119 = vector.broadcast %111 : vector<16x1xf32> to vector<16x32xf32>
    %120 = arith.subf %107, %119 : vector<16x32xf32>
    %cst_41 = arith.constant 9.99999997E-7 : f32
    %121 = vector.broadcast %cst_41 : f32 to vector<16x1xf32>
    %122 = arith.addf %118, %121 : vector<16x1xf32>
    %123 = math.rsqrt %122 : vector<16x1xf32>
    %124 = vector.broadcast %123 : vector<16x1xf32> to vector<16x32xf32>
    %125 = arith.mulf %120, %124 : vector<16x32xf32>
    %126 = vector.broadcast %17 : vector<1x32xf32> to vector<16x32xf32>
    %127 = arith.mulf %125, %126 : vector<16x32xf32>
    %128 = vector.broadcast %18 : vector<1x32xf32> to vector<16x32xf32>
    %129 = arith.addf %127, %128 : vector<16x32xf32>
    %c0_42 = arith.constant 0 : index
    %c0_43 = arith.constant 0 : index
    %c0_44 = arith.constant 0 : index
    %130 = vector.load %arg7[%c0_42, %c0_43, %c0_44] : memref<2x32x64xf32, #tpu.memory_space<vmem>>, vector<1x32x64xf32>
    %131 = vector.shape_cast %130 : vector<1x32x64xf32> to vector<32x64xf32>
    %cst_45 = arith.constant dense<0.000000e+00> : vector<16x64xf32>
    %132 = tpu.matmul %129, %131, %cst_45 {dimension_numbers = #tpu.dot_dimension_numbers<[1], [0], [0], [1], [0, 0, 1, 1], [], []>} : vector<16x32xf32>, vector<32x64xf32>, vector<16x64xf32> -> vector<16x64xf32>
    %c0_46 = arith.constant 0 : index
    %c0_47 = arith.constant 0 : index
    %c0_48 = arith.constant 0 : index
    %133 = vector.load %arg8[%c0_46, %c0_47, %c0_48] : memref<2x1x64xf32, #tpu.memory_space<vmem>>, vector<1x1x64xf32>
    %134 = vector.shape_cast %133 : vector<1x1x64xf32> to vector<1x64xf32>
    %135 = vector.broadcast %134 : vector<1x64xf32> to vector<16x64xf32>
    %136 = arith.addf %132, %135 : vector<16x64xf32>
    %cst_49 = arith.constant 0.000000e+00 : f32
    %137 = vector.broadcast %cst_49 : f32 to vector<16x64xf32>
    %138 = arith.maximumf %136, %137 : vector<16x64xf32>
    %c0_50 = arith.constant 0 : index
    %c0_51 = arith.constant 0 : index
    %c0_52 = arith.constant 0 : index
    %139 = vector.load %arg9[%c0_50, %c0_51, %c0_52] : memref<2x64x32xf32, #tpu.memory_space<vmem>>, vector<1x64x32xf32>
    %140 = vector.shape_cast %139 : vector<1x64x32xf32> to vector<64x32xf32>
    %cst_53 = arith.constant dense<0.000000e+00> : vector<16x32xf32>
    %141 = tpu.matmul %138, %140, %cst_53 {dimension_numbers = #tpu.dot_dimension_numbers<[1], [0], [0], [1], [0, 0, 1, 1], [], []>} : vector<16x64xf32>, vector<64x32xf32>, vector<16x32xf32> -> vector<16x32xf32>
    %c0_54 = arith.constant 0 : index
    %c0_55 = arith.constant 0 : index
    %c0_56 = arith.constant 0 : index
    %142 = vector.load %arg10[%c0_54, %c0_55, %c0_56] : memref<2x1x32xf32, #tpu.memory_space<vmem>>, vector<1x1x32xf32>
    %143 = vector.shape_cast %142 : vector<1x1x32xf32> to vector<1x32xf32>
    %144 = vector.broadcast %143 : vector<1x32xf32> to vector<16x32xf32>
    %145 = arith.addf %141, %144 : vector<16x32xf32>
    %146 = arith.addf %107, %145 : vector<16x32xf32>
    %c1 = arith.constant 1 : index
    %c0_57 = arith.constant 0 : index
    %c0_58 = arith.constant 0 : index
    %147 = vector.load %arg2[%c1, %c0_57, %c0_58] : memref<2x4x32xf32, #tpu.memory_space<vmem>>, vector<1x4x32xf32>
    %148 = vector.shape_cast %147 : vector<1x4x32xf32> to vector<4x32xf32>
    %149 = vector.extract_strided_slice %148 {offsets = [0, 0], sizes = [1, 32], strides = [1, 1]} : vector<4x32xf32> to vector<1x32xf32>
    %150 = vector.extract_strided_slice %148 {offsets = [1, 0], sizes = [1, 32], strides = [1, 1]} : vector<4x32xf32> to vector<1x32xf32>
    %151 = vector.extract_strided_slice %148 {offsets = [2, 0], sizes = [1, 32], strides = [1, 1]} : vector<4x32xf32> to vector<1x32xf32>
    %152 = vector.extract_strided_slice %148 {offsets = [3, 0], sizes = [1, 32], strides = [1, 1]} : vector<4x32xf32> to vector<1x32xf32>
    %cst_59 = arith.constant dense<0.000000e+00> : vector<16xf32>
    %153 = vector.multi_reduction <add>, %146, %cst_59 [1] : vector<16x32xf32> to vector<16xf32>
    %154 = vector.shape_cast %153 : vector<16xf32> to vector<16x1xf32>
    %cst_60 = arith.constant 3.200000e+01 : f32
    %155 = vector.broadcast %cst_60 : f32 to vector<16x1xf32>
    %156 = arith.divf %154, %155 : vector<16x1xf32>
    %157 = vector.broadcast %156 : vector<16x1xf32> to vector<16x32xf32>
    %158 = arith.subf %146, %157 : vector<16x32xf32>
    %159 = arith.mulf %158, %158 : vector<16x32xf32>
    %cst_61 = arith.constant dense<0.000000e+00> : vector<16xf32>
    %160 = vector.multi_reduction <add>, %159, %cst_61 [1] : vector<16x32xf32> to vector<16xf32>
    %161 = vector.shape_cast %160 : vector<16xf32> to vector<16x1xf32>
    %cst_62 = arith.constant 3.200000e+01 : f32
    %162 = vector.broadcast %cst_62 : f32 to vector<16x1xf32>
    %163 = arith.divf %161, %162 : vector<16x1xf32>
    %164 = vector.broadcast %156 : vector<16x1xf32> to vector<16x32xf32>
    %165 = arith.subf %146, %164 : vector<16x32xf32>
    %cst_63 = arith.constant 9.99999997E-7 : f32
    %166 = vector.broadcast %cst_63 : f32 to vector<16x1xf32>
    %167 = arith.addf %163, %166 : vector<16x1xf32>
    %168 = math.rsqrt %167 : vector<16x1xf32>
    %169 = vector.broadcast %168 : vector<16x1xf32> to vector<16x32xf32>
    %170 = arith.mulf %165, %169 : vector<16x32xf32>
    %171 = vector.broadcast %149 : vector<1x32xf32> to vector<16x32xf32>
    %172 = arith.mulf %170, %171 : vector<16x32xf32>
    %173 = vector.broadcast %150 : vector<1x32xf32> to vector<16x32xf32>
    %174 = arith.addf %172, %173 : vector<16x32xf32>
    %c1_64 = arith.constant 1 : index
    %c0_65 = arith.constant 0 : index
    %c0_66 = arith.constant 0 : index
    %175 = vector.load %arg3[%c1_64, %c0_65, %c0_66] : memref<2x32x96xf32, #tpu.memory_space<vmem>>, vector<1x32x96xf32>
    %176 = vector.shape_cast %175 : vector<1x32x96xf32> to vector<32x96xf32>
    %cst_67 = arith.constant dense<0.000000e+00> : vector<16x96xf32>
    %177 = tpu.matmul %174, %176, %cst_67 {dimension_numbers = #tpu.dot_dimension_numbers<[1], [0], [0], [1], [0, 0, 1, 1], [], []>} : vector<16x32xf32>, vector<32x96xf32>, vector<16x96xf32> -> vector<16x96xf32>
    %c1_68 = arith.constant 1 : index
    %c0_69 = arith.constant 0 : index
    %c0_70 = arith.constant 0 : index
    %178 = vector.load %arg4[%c1_68, %c0_69, %c0_70] : memref<2x1x96xf32, #tpu.memory_space<vmem>>, vector<1x1x96xf32>
    %179 = vector.shape_cast %178 : vector<1x1x96xf32> to vector<1x96xf32>
    %180 = vector.broadcast %179 : vector<1x96xf32> to vector<16x96xf32>
    %181 = arith.addf %177, %180 : vector<16x96xf32>
    %182 = vector.extract_strided_slice %181 {offsets = [0, 0], sizes = [16, 32], strides = [1, 1]} : vector<16x96xf32> to vector<16x32xf32>
    %183 = vector.extract_strided_slice %181 {offsets = [0, 32], sizes = [16, 32], strides = [1, 1]} : vector<16x96xf32> to vector<16x32xf32>
    %184 = vector.extract_strided_slice %181 {offsets = [0, 64], sizes = [16, 32], strides = [1, 1]} : vector<16x96xf32> to vector<16x32xf32>
    %185 = vector.extract_strided_slice %182 {offsets = [0, 0], sizes = [8, 32], strides = [1, 1]} : vector<16x32xf32> to vector<8x32xf32>
    %186 = vector.shape_cast %185 : vector<8x32xf32> to vector<8x4x8xf32>
    %187 = vector.extract_strided_slice %183 {offsets = [0, 0], sizes = [8, 32], strides = [1, 1]} : vector<16x32xf32> to vector<8x32xf32>
    %188 = vector.shape_cast %187 : vector<8x32xf32> to vector<8x4x8xf32>
    %189 = vector.extract_strided_slice %184 {offsets = [0, 0], sizes = [8, 32], strides = [1, 1]} : vector<16x32xf32> to vector<8x32xf32>
    %190 = vector.shape_cast %189 : vector<8x32xf32> to vector<8x4x8xf32>
    "tpu.trace_start"() <{level = 10 : i32, message = "qhd,khd->hqk"}> : () -> ()
    %cst_71 = arith.constant dense<0.000000e+00> : vector<4x8x8xf32>
    %191 = tpu.matmul %186, %188, %cst_71 {dimension_numbers = #tpu.dot_dimension_numbers<[2], [2], [0], [0], [0, 1, 0, 0, 1, 0], [1], [1]>} : vector<8x4x8xf32>, vector<8x4x8xf32>, vector<4x8x8xf32> -> vector<4x8x8xf32>
    "tpu.trace_stop"() : () -> ()
    %cst_72 = arith.constant 0.353553385 : f32
    %192 = vector.broadcast %cst_72 : f32 to vector<4x8x8xf32>
    %193 = arith.mulf %191, %192 : vector<4x8x8xf32>
    %194 = vector.broadcast %9 : vector<1x1x8xf32> to vector<4x8x8xf32>
    %195 = arith.addf %193, %194 : vector<4x8x8xf32>
    %cst_73 = arith.constant dense<0xFF800000> : vector<4x8xf32>
    %196 = vector.multi_reduction <maximumf>, %195, %cst_73 [2] : vector<4x8x8xf32> to vector<4x8xf32>
    %197 = vector.shape_cast %196 : vector<4x8xf32> to vector<4x8x1xf32>
    %198 = vector.broadcast %197 : vector<4x8x1xf32> to vector<4x8x8xf32>
    %199 = arith.subf %195, %198 : vector<4x8x8xf32>
    %200 = math.exp %199 : vector<4x8x8xf32>
    %cst_74 = arith.constant dense<0.000000e+00> : vector<4x8xf32>
    %201 = vector.multi_reduction <add>, %200, %cst_74 [2] : vector<4x8x8xf32> to vector<4x8xf32>
    %202 = vector.shape_cast %201 : vector<4x8xf32> to vector<4x8x1xf32>
    %203 = tpu.reciprocal %202 {approx = true} : vector<4x8x1xf32> -> vector<4x8x1xf32>
    %204 = vector.broadcast %203 : vector<4x8x1xf32> to vector<4x8x8xf32>
    %205 = arith.mulf %200, %204 : vector<4x8x8xf32>
    "tpu.trace_start"() <{level = 10 : i32, message = "hqk,khd->qhd"}> : () -> ()
    %cst_75 = arith.constant dense<0.000000e+00> : vector<4x8x8xf32>
    %206 = tpu.matmul %190, %205, %cst_75 {dimension_numbers = #tpu.dot_dimension_numbers<[0], [2], [2], [1], [0, 1, 0, 2, 1, 1], [1], [0]>} : vector<8x4x8xf32>, vector<4x8x8xf32>, vector<4x8x8xf32> -> vector<4x8x8xf32>
    %207 = tpu.transpose %206, [2, 0, 1] : vector<4x8x8xf32> -> vector<8x4x8xf32>
    "tpu.trace_stop"() : () -> ()
    %208 = vector.shape_cast %207 : vector<8x4x8xf32> to vector<8x32xf32>
    %209 = vector.extract_strided_slice %182 {offsets = [8, 0], sizes = [8, 32], strides = [1, 1]} : vector<16x32xf32> to vector<8x32xf32>
    %210 = vector.shape_cast %209 : vector<8x32xf32> to vector<8x4x8xf32>
    %211 = vector.extract_strided_slice %183 {offsets = [8, 0], sizes = [8, 32], strides = [1, 1]} : vector<16x32xf32> to vector<8x32xf32>
    %212 = vector.shape_cast %211 : vector<8x32xf32> to vector<8x4x8xf32>
    %213 = vector.extract_strided_slice %184 {offsets = [8, 0], sizes = [8, 32], strides = [1, 1]} : vector<16x32xf32> to vector<8x32xf32>
    %214 = vector.shape_cast %213 : vector<8x32xf32> to vector<8x4x8xf32>
    "tpu.trace_start"() <{level = 10 : i32, message = "qhd,khd->hqk"}> : () -> ()
    %cst_76 = arith.constant dense<0.000000e+00> : vector<4x8x8xf32>
    %215 = tpu.matmul %210, %212, %cst_76 {dimension_numbers = #tpu.dot_dimension_numbers<[2], [2], [0], [0], [0, 1, 0, 0, 1, 0], [1], [1]>} : vector<8x4x8xf32>, vector<8x4x8xf32>, vector<4x8x8xf32> -> vector<4x8x8xf32>
    "tpu.trace_stop"() : () -> ()
    %cst_77 = arith.constant 0.353553385 : f32
    %216 = vector.broadcast %cst_77 : f32 to vector<4x8x8xf32>
    %217 = arith.mulf %215, %216 : vector<4x8x8xf32>
    %218 = vector.broadcast %12 : vector<1x1x8xf32> to vector<4x8x8xf32>
    %219 = arith.addf %217, %218 : vector<4x8x8xf32>
    %cst_78 = arith.constant dense<0xFF800000> : vector<4x8xf32>
    %220 = vector.multi_reduction <maximumf>, %219, %cst_78 [2] : vector<4x8x8xf32> to vector<4x8xf32>
    %221 = vector.shape_cast %220 : vector<4x8xf32> to vector<4x8x1xf32>
    %222 = vector.broadcast %221 : vector<4x8x1xf32> to vector<4x8x8xf32>
    %223 = arith.subf %219, %222 : vector<4x8x8xf32>
    %224 = math.exp %223 : vector<4x8x8xf32>
    %cst_79 = arith.constant dense<0.000000e+00> : vector<4x8xf32>
    %225 = vector.multi_reduction <add>, %224, %cst_79 [2] : vector<4x8x8xf32> to vector<4x8xf32>
    %226 = vector.shape_cast %225 : vector<4x8xf32> to vector<4x8x1xf32>
    %227 = tpu.reciprocal %226 {approx = true} : vector<4x8x1xf32> -> vector<4x8x1xf32>
    %228 = vector.broadcast %227 : vector<4x8x1xf32> to vector<4x8x8xf32>
    %229 = arith.mulf %224, %228 : vector<4x8x8xf32>
    "tpu.trace_start"() <{level = 10 : i32, message = "hqk,khd->qhd"}> : () -> ()
    %cst_80 = arith.constant dense<0.000000e+00> : vector<4x8x8xf32>
    %230 = tpu.matmul %214, %229, %cst_80 {dimension_numbers = #tpu.dot_dimension_numbers<[0], [2], [2], [1], [0, 1, 0, 2, 1, 1], [1], [0]>} : vector<8x4x8xf32>, vector<4x8x8xf32>, vector<4x8x8xf32> -> vector<4x8x8xf32>
    %231 = tpu.transpose %230, [2, 0, 1] : vector<4x8x8xf32> -> vector<8x4x8xf32>
    "tpu.trace_stop"() : () -> ()
    %232 = vector.shape_cast %231 : vector<8x4x8xf32> to vector<8x32xf32>
    %233 = tpu.concatenate %208, %232 in 0 : vector<8x32xf32>, vector<8x32xf32> -> vector<16x32xf32>
    %c1_81 = arith.constant 1 : index
    %c0_82 = arith.constant 0 : index
    %c0_83 = arith.constant 0 : index
    %234 = vector.load %arg5[%c1_81, %c0_82, %c0_83] : memref<2x32x32xf32, #tpu.memory_space<vmem>>, vector<1x32x32xf32>
    %235 = vector.shape_cast %234 : vector<1x32x32xf32> to vector<32x32xf32>
    %cst_84 = arith.constant dense<0.000000e+00> : vector<16x32xf32>
    %236 = tpu.matmul %233, %235, %cst_84 {dimension_numbers = #tpu.dot_dimension_numbers<[1], [0], [0], [1], [0, 0, 1, 1], [], []>} : vector<16x32xf32>, vector<32x32xf32>, vector<16x32xf32> -> vector<16x32xf32>
    %c1_85 = arith.constant 1 : index
    %c0_86 = arith.constant 0 : index
    %c0_87 = arith.constant 0 : index
    %237 = vector.load %arg6[%c1_85, %c0_86, %c0_87] : memref<2x1x32xf32, #tpu.memory_space<vmem>>, vector<1x1x32xf32>
    %238 = vector.shape_cast %237 : vector<1x1x32xf32> to vector<1x32xf32>
    %239 = vector.broadcast %238 : vector<1x32xf32> to vector<16x32xf32>
    %240 = arith.addf %236, %239 : vector<16x32xf32>
    %241 = arith.addf %146, %240 : vector<16x32xf32>
    %cst_88 = arith.constant dense<0.000000e+00> : vector<16xf32>
    %242 = vector.multi_reduction <add>, %241, %cst_88 [1] : vector<16x32xf32> to vector<16xf32>
    %243 = vector.shape_cast %242 : vector<16xf32> to vector<16x1xf32>
    %cst_89 = arith.constant 3.200000e+01 : f32
    %244 = vector.broadcast %cst_89 : f32 to vector<16x1xf32>
    %245 = arith.divf %243, %244 : vector<16x1xf32>
    %246 = vector.broadcast %245 : vector<16x1xf32> to vector<16x32xf32>
    %247 = arith.subf %241, %246 : vector<16x32xf32>
    %248 = arith.mulf %247, %247 : vector<16x32xf32>
    %cst_90 = arith.constant dense<0.000000e+00> : vector<16xf32>
    %249 = vector.multi_reduction <add>, %248, %cst_90 [1] : vector<16x32xf32> to vector<16xf32>
    %250 = vector.shape_cast %249 : vector<16xf32> to vector<16x1xf32>
    %cst_91 = arith.constant 3.200000e+01 : f32
    %251 = vector.broadcast %cst_91 : f32 to vector<16x1xf32>
    %252 = arith.divf %250, %251 : vector<16x1xf32>
    %253 = vector.broadcast %245 : vector<16x1xf32> to vector<16x32xf32>
    %254 = arith.subf %241, %253 : vector<16x32xf32>
    %cst_92 = arith.constant 9.99999997E-7 : f32
    %255 = vector.broadcast %cst_92 : f32 to vector<16x1xf32>
    %256 = arith.addf %252, %255 : vector<16x1xf32>
    %257 = math.rsqrt %256 : vector<16x1xf32>
    %258 = vector.broadcast %257 : vector<16x1xf32> to vector<16x32xf32>
    %259 = arith.mulf %254, %258 : vector<16x32xf32>
    %260 = vector.broadcast %151 : vector<1x32xf32> to vector<16x32xf32>
    %261 = arith.mulf %259, %260 : vector<16x32xf32>
    %262 = vector.broadcast %152 : vector<1x32xf32> to vector<16x32xf32>
    %263 = arith.addf %261, %262 : vector<16x32xf32>
    %c1_93 = arith.constant 1 : index
    %c0_94 = arith.constant 0 : index
    %c0_95 = arith.constant 0 : index
    %264 = vector.load %arg7[%c1_93, %c0_94, %c0_95] : memref<2x32x64xf32, #tpu.memory_space<vmem>>, vector<1x32x64xf32>
    %265 = vector.shape_cast %264 : vector<1x32x64xf32> to vector<32x64xf32>
    %cst_96 = arith.constant dense<0.000000e+00> : vector<16x64xf32>
    %266 = tpu.matmul %263, %265, %cst_96 {dimension_numbers = #tpu.dot_dimension_numbers<[1], [0], [0], [1], [0, 0, 1, 1], [], []>} : vector<16x32xf32>, vector<32x64xf32>, vector<16x64xf32> -> vector<16x64xf32>
    %c1_97 = arith.constant 1 : index
    %c0_98 = arith.constant 0 : index
    %c0_99 = arith.constant 0 : index
    %267 = vector.load %arg8[%c1_97, %c0_98, %c0_99] : memref<2x1x64xf32, #tpu.memory_space<vmem>>, vector<1x1x64xf32>
    %268 = vector.shape_cast %267 : vector<1x1x64xf32> to vector<1x64xf32>
    %269 = vector.broadcast %268 : vector<1x64xf32> to vector<16x64xf32>
    %270 = arith.addf %266, %269 : vector<16x64xf32>
    %cst_100 = arith.constant 0.000000e+00 : f32
    %271 = vector.broadcast %cst_100 : f32 to vector<16x64xf32>
    %272 = arith.maximumf %270, %271 : vector<16x64xf32>
    %c1_101 = arith.constant 1 : index
    %c0_102 = arith.constant 0 : index
    %c0_103 = arith.constant 0 : index
    %273 = vector.load %arg9[%c1_101, %c0_102, %c0_103] : memref<2x64x32xf32, #tpu.memory_space<vmem>>, vector<1x64x32xf32>
    %274 = vector.shape_cast %273 : vector<1x64x32xf32> to vector<64x32xf32>
    %cst_104 = arith.constant dense<0.000000e+00> : vector<16x32xf32>
    %275 = tpu.matmul %272, %274, %cst_104 {dimension_numbers = #tpu.dot_dimension_numbers<[1], [0], [0], [1], [0, 0, 1, 1], [], []>} : vector<16x64xf32>, vector<64x32xf32>, vector<16x32xf32> -> vector<16x32xf32>
    %c1_105 = arith.constant 1 : index
    %c0_106 = arith.constant 0 : index
    %c0_107 = arith.constant 0 : index
    %276 = vector.load %arg10[%c1_105, %c0_106, %c0_107] : memref<2x1x32xf32, #tpu.memory_space<vmem>>, vector<1x1x32xf32>
    %277 = vector.shape_cast %276 : vector<1x1x32xf32> to vector<1x32xf32>
    %278 = vector.broadcast %277 : vector<1x32xf32> to vector<16x32xf32>
    %279 = arith.addf %275, %278 : vector<16x32xf32>
    %280 = arith.addf %241, %279 : vector<16x32xf32>
    %c0_108 = arith.constant 0 : index
    %c0_109 = arith.constant 0 : index
    %281 = vector.load %arg11[%c0_108, %c0_109] : memref<2x32xf32, #tpu.memory_space<vmem>>, vector<2x32xf32>
    %282 = vector.extract_strided_slice %281 {offsets = [0, 0], sizes = [1, 32], strides = [1, 1]} : vector<2x32xf32> to vector<1x32xf32>
    %283 = vector.extract_strided_slice %281 {offsets = [1, 0], sizes = [1, 32], strides = [1, 1]} : vector<2x32xf32> to vector<1x32xf32>
    %cst_110 = arith.constant dense<0.000000e+00> : vector<16xf32>
    %284 = vector.multi_reduction <add>, %280, %cst_110 [1] : vector<16x32xf32> to vector<16xf32>
    %285 = vector.shape_cast %284 : vector<16xf32> to vector<16x1xf32>
    %cst_111 = arith.constant 3.200000e+01 : f32
    %286 = vector.broadcast %cst_111 : f32 to vector<16x1xf32>
    %287 = arith.divf %285, %286 : vector<16x1xf32>
    %288 = vector.broadcast %287 : vector<16x1xf32> to vector<16x32xf32>
    %289 = arith.subf %280, %288 : vector<16x32xf32>
    %290 = arith.mulf %289, %289 : vector<16x32xf32>
    %cst_112 = arith.constant dense<0.000000e+00> : vector<16xf32>
    %291 = vector.multi_reduction <add>, %290, %cst_112 [1] : vector<16x32xf32> to vector<16xf32>
    %292 = vector.shape_cast %291 : vector<16xf32> to vector<16x1xf32>
    %cst_113 = arith.constant 3.200000e+01 : f32
    %293 = vector.broadcast %cst_113 : f32 to vector<16x1xf32>
    %294 = arith.divf %292, %293 : vector<16x1xf32>
    %295 = vector.broadcast %287 : vector<16x1xf32> to vector<16x32xf32>
    %296 = arith.subf %280, %295 : vector<16x32xf32>
    %cst_114 = arith.constant 9.99999997E-7 : f32
    %297 = vector.broadcast %cst_114 : f32 to vector<16x1xf32>
    %298 = arith.addf %294, %297 : vector<16x1xf32>
    %299 = math.rsqrt %298 : vector<16x1xf32>
    %300 = vector.broadcast %299 : vector<16x1xf32> to vector<16x32xf32>
    %301 = arith.mulf %296, %300 : vector<16x32xf32>
    %302 = vector.broadcast %282 : vector<1x32xf32> to vector<16x32xf32>
    %303 = arith.mulf %301, %302 : vector<16x32xf32>
    %304 = vector.broadcast %283 : vector<1x32xf32> to vector<16x32xf32>
    %305 = arith.addf %303, %304 : vector<16x32xf32>
    %c0_115 = arith.constant 0 : index
    %c0_116 = arith.constant 0 : index
    %306 = vector.load %arg12[%c0_115, %c0_116] : memref<16x32xf32, #tpu.memory_space<vmem>>, vector<16x32xf32>
    tpu.vector_store %arg12[%c0_115, %c0_116], %305 {strides = array<i32>} : memref<16x32xf32, #tpu.memory_space<vmem>>, vector<16x32xf32>,
    return
  }
}

</mosaic_0001>

<bundles_post_ra>
// kernel: encoder_forward.1
= control target key start
LH: loop header
LB: loop body
LE: loop exit
PB: predicated region body
PF: predicated region fallthrough
CT: control target
= control target key end

     0   :  { %vm48_vm0 = vcmask 261120   ;;  %s7398_s0 = inlined_call_operand.vmem [shape: f32[16,32], index: 0, kind: input, shape index: {}]   ;;  %s7399_s1 = inlined_call_operand.vmem [shape: f32[2,8], index: 1, kind: input, shape index: {}]   ;;  %s7400_s2 = inlined_call_operand.vmem [shape: f32[2,4,32], index: 2, kind: input, shape index: {}]   ;;  %s7401_s3 = inlined_call_operand.vmem [shape: f32[2,32,96], index: 3, kind: input, shape index: {}]   ;;  %s7402_s4 = inlined_call_operand.vmem [shape: f32[2,1,96], index: 4, kind: input, shape index: {}]   ;;  %s7403_s5 = inlined_call_operand.vmem [shape: f32[2,32,32], index: 5, kind: input, shape index: {}]   ;;  %s7404_s6 = inlined_call_operand.vmem [shape: f32[2,1,32], index: 6, kind: input, shape index: {}]   ;;  %s7405_s7 = inlined_call_operand.vmem [shape: f32[2,32,64], index: 7, kind: input, shape index: {}]   ;;  %s7406_s8 = inlined_call_operand.vmem [shape: f32[2,1,64], index: 8, kind: input, shape index: {}]   ;;  %s7407_s9 = inlined_call_operand.vmem [shape: f32[2,64,32], index: 9, kind: input, shape index: {}]   ;;  %s7408_s10 = inlined_call_operand.vmem [shape: f32[2,1,32], index: 10, kind: input, shape index: {}]   ;;  %s7409_s11 = inlined_call_operand.vmem [shape: f32[2,32], index: 11, kind: input, shape index: {}]   ;;  %s7410_s12 = inlined_call_operand.hbm [shape: f32[16,32], index: 12, kind: output, shape index: {}]  }
   0x1   :  { %v6653_v0 = vld [vmem:[%s7398_s0] sm:$0xff]  ;;  %v6658_v1 = vld [vmem:[%s7398_s0 + $0x8] sm:$0xff] }
   0x2   :  { %17 = vsyncpa [#allocation3], 0  ;;  %v49_v2 = vsel %vm48_vm0, %v6653_v0, 0.0  ;;  %v52_v3 = vsel %vm48_vm0, %v6658_v1, 0.0  ;;  %v88_v14 = vld [vmem:[%s7401_s3] sm:$0xff]  ;;  %v89_v15 = vld [vmem:[%s7401_s3 + $0x8] sm:$0xff]  ;;  %v76_v22 = vlaneseq }
   0x3   :  { %50 = vadd.xlane.f32.xlu0 %v49_v2  ;;  %v90_v16 = vld [vmem:[%s7401_s3 + $0x10] sm:$0xff]  ;;  %v6366_v17 = vpack.c.bf16 %v89_v15, %v88_v14  ;;  %v91_v18 = vld [vmem:[%s7401_s3 + $0x18] sm:$0xff]  ;;  %v47_v29 = vld [vmem:[%s7400_s2] sm:$0xf]  ;;  %s6570_s18 = smov 112   ;;  %s6571_s19 = smov 120  }
   0x4   :  { %v6370_v19 = vpack.c.bf16 %v91_v18, %v90_v16  ;;  %v6680_v26 = vshrl.u32 %v76_v22, 7  ;;  %v5877_v41 = vld [vmem:[%s7402_s4] ss:$0 sm:$0xff]  ;;  %s6572_s20 = smov 104   ;;  %s6573_s21 = smov 96   ;;  %v6574_v49 = vmov 0.0  }
   0x5   :  { %6367 = vmatprep.subr.bf16.mxu0 %v6366_v17  ;;  %6113 = vmatprep.subr.mxu1 %v6574_v49  ;;  %vm6575_vm1 = vmmov 0   ;;  %vm327_vm2 = vcmask 64512   ;;  %v44_v58 = vld [vmem:[%s7399_s1] sm:$0x3]  ;;  %v6576_v59 = vmov -1e+09  }
   0x6   :  { %6369 = vmatpush3.bf16.msra.mxu0 %v6366_v17  ;;  %v6683_v28 = vsub.s32 0, %v6680_v26  ;;  %v6689_v30 = vsub.s32 1, %v6680_v26  ;;  %6115 = vmatprep.mubr.msk.f32.mxu1 %vm6575_vm1, %v6574_v49  ;;  %vm45_vm3 = vcmp.gt.f32.partialorder %v44_v58, 0.5  ;;  %s6577_s1 = smov 64   ;;  %s6580_s24 = smov 8   ;;  %vm1393_vm4 = vcmask 130048  }
   0x7   :  { %53 = vadd.xlane.f32.xlu0 %v52_v3  ;;  %6371 = vmatprep.subr.bf16.mxu0 %v6370_v19  ;;  %v6755_v60 = vsel %vm45_vm3, 0.0, %v6576_v59  ;;  %s6581_s0 = smov 24   ;;  %s6582_s25 = smov 16   ;;  %vm1395_vm5 = vcmask 195584   ;;  %vm2852_vm6 = vcmask 523264  }
   0x8   :  { %v79_v31 = vrot.slane %v47_v29, %v6683_v28  ;;  %v85_v34 = vrot.slane %v47_v29, %v6689_v30  ;;  %v6759_v61 = vrot.slane %v6755_v60, %v6683_v28 }
   0xa   :  { %6373 = vmatpush3.bf16.msra.mxu0 %v6370_v19 }
   0xb   :  { %6128 = vmatprep.subr.mxu0 %v6574_v49 }
  0x90   :  { %v51_v4 = vpop.xlane.xlu0 %50 }
  0x91   :  { %v56_v5 = vmul.f32 0.03125, %v51_v4 }
  0x93   :  { %v58_v6 = vsub.f32 %v6653_v0, %v56_v5 }
  0x94   :  { %v54_v7 = vpop.xlane.xlu0 %53 }
  0x95   :  { %v57_v8 = vmul.f32 0.03125, %v54_v7  ;;  %v60_v9 = vmul.f32 %v58_v6, %v58_v6 }
  0x97   :  { %v59_v10 = vsub.f32 %v6658_v1, %v57_v8  ;;  %v62_v11 = vsel %vm48_vm0, %v60_v9, 0.0 }
  0x98   :  { %63 = vadd.xlane.f32.xlu1 %v62_v11 }
  0x99   :  { %v61_v12 = vmul.f32 %v59_v10, %v59_v10 }
  0x9b   :  { %v65_v13 = vsel %vm48_vm0, %v61_v12, 0.0 }
  0x9c   :  { %66 = vadd.xlane.f32.xlu1 %v65_v13 }
 0x125   :  { %v64_v20 = vpop.xlane.xlu1 %63 }
 0x126   :  { %v68_v21 = vmul.f32 0.03125, %v64_v20 }
 0x128   :  { %v70_v23 = vadd.f32 1e-06, %v68_v21 }
 0x129   :  { %v67_v24 = vpop.xlane.xlu1 %66 }
 0x12a   :  { %6461 = vrsqrt.f32 %v70_v23  ;;  %v69_v25 = vmul.f32 0.03125, %v67_v24 }
 0x12c   :  { %v71_v27 = vadd.f32 1e-06, %v69_v25 }
 0x12e   :  { %6463 = vrsqrt.f32 %v71_v27 }
 0x134   :  { %v6462_v32 = vpop.eup %6461 }
 0x135   :  { %v74_v33 = vmul.f32 %v6462_v32, %v58_v6 }
 0x137   :  { %v80_v35 = vmul.f32 %v79_v31, %v74_v33 }
 0x138   :  { %v6464_v36 = vpop.eup %6463 }
 0x139   :  { %v75_v37 = vmul.f32 %v6464_v36, %v59_v10  ;;  %v86_v38 = vadd.f32 %v85_v34, %v80_v35 }
 0x13b   :  { %v81_v39 = vmul.f32 %v79_v31, %v75_v37  ;;  %6110 = vmatprep.mubr.msk.f32.mxu0 %vm48_vm0, %v86_v38 }
 0x13d   :  { %v87_v40 = vadd.f32 %v85_v34, %v81_v39 }
 0x13f   :  { %6111 = vmatmul.mubr.msk.f32.vlgmr.msra.gmra.mrb[0].mxu0 %vm48_vm0, %v87_v40 }
 0x140   :  { %6130 = vmatprep.mubr.msk.f32.mxu0 %vm6575_vm1, %v6574_v49 }
 0x212   :  { %v6112_v42 = vpop.f32.mrb[0].mxu0 }
 0x213   :  { %v6698_v43 = vadd.f32 %v6112_v42, %v5877_v41  ;;  %v171_v44 = vpop.f32.mrb[1].mxu0 }
 0x214   :  { %v6700_v45 = vadd.f32 %v5877_v41, %v171_v44 }
 0x216   :  { %183 = vrot.lane.b32.xlu1 %v6700_v45, %s6570_s18  ;;  %181 = vrot.lane.b32.xlu0 %v6700_v45, %s6571_s19 }
 0x21a   :  { %185 = vrot.lane.b32.xlu1 %v6700_v45, %s6572_s20 }
 0x21e   :  { %187 = vrot.lane.b32.xlu1 %v6700_v45, %s6573_s21 }
 0x288   :  { %v6710_v46 = vpop.permute.xlu1 %183  ;;  %v6712_v47 = vpop.permute.xlu0 %181 }
 0x289   :  { %191 = vrot.lane.b32.xlu1 %v6710_v46, %s6573_s21  ;;  %189 = vrot.lane.b32.xlu0 %v6712_v47, %s6573_s21 }
 0x28c   :  { %v6718_v48 = vpop.permute.xlu1 %185 }
 0x28d   :  { %193 = vrot.lane.b32.xlu0 %v6718_v48, %s6573_s21 }
 0x290   :  { %v188_v50 = vpop.permute.xlu1 %187 }
 0x2b2   :  { %199 = vxpose.xlu1.b32.start.end [1/1] (short) (narrow) %v188_v50, 8 }
 0x2d0   :  { %1398 = vrot.lane.b32.xlu1 %v6698_v43, %s6571_s19 }
 0x2fb   :  { %v190_v51 = vpop.permute.xlu0 %189  ;;  %v192_v52 = vpop.permute.xlu1 %191 }
 0x2fc   :  { %231 = vxpose.xlu0.b32.start.end [1/1] (short) (narrow) %v190_v51, 8 }
 0x2ff   :  { %v194_v53 = vpop.permute.xlu0 %193 }
 0x300   :  { %263 = vxpose.xlu0.b32.start.end [1/1] (short) (narrow) %v192_v52, 8 }
 0x304   :  { %295 = vxpose.xlu0.b32.start.end [1/1] (short) (narrow) %v194_v53, 8 }
 0x32d   :  { %1400 = vrot.lane.b32.xlu0 %v6698_v43, %s6570_s18 }
 0x332   :  { %v215_v54 = vpop.trf.xlu1 }
 0x333   :  { %6114 = vmatpush3.msra.mxu1 %v215_v54 }
 0x334   :  { %6116 = vmatmul.mubr.msk.f32.vlgmr.msra.gmra.mrb[0].mxu1 %vm327_vm2, %v6700_v45  ;;  %6118 = vmatprep.subr.mxu1 %v6574_v49 }
 0x335   :  { %6120 = vmatprep.mubr.msk.f32.mxu1 %vm6575_vm1, %v6574_v49 }
 0x342   :  { %v6777_v20 = vpop.permute.xlu1 %1398 }
 0x37c   :  { %v247_v55 = vpop.trf.xlu0 }
 0x37d   :  { %6119 = vmatpush3.msra.mxu1 %v247_v55 }
 0x37e   :  { %6121 = vmatmul.mubr.msk.f32.vlgmr.msra.gmra.mrb[2].mxu1 %vm327_vm2, %v6712_v47  ;;  %6123 = vmatprep.subr.mxu1 %v6574_v49 }
 0x37f   :  { %6125 = vmatprep.mubr.msk.f32.mxu1 %vm6575_vm1, %v6574_v49 }
 0x380   :  { %v279_v56 = vpop.trf.xlu0 }
 0x381   :  { %6124 = vmatpush3.msra.mxu1 %v279_v56 }
 0x382   :  { %6126 = vmatmul.mubr.msk.f32.vlgmr.msra.gmra.mrb[4].mxu1 %vm327_vm2, %v6710_v46  ;;  %6133 = vmatprep.subr.mxu1 %v6574_v49 }
 0x383   :  { %6135 = vmatprep.mubr.msk.f32.mxu1 %vm6575_vm1, %v6574_v49 }
 0x384   :  { %v311_v57 = vpop.trf.xlu0 }
 0x385   :  { %6129 = vmatpush3.msra.mxu0 %v311_v57 }
 0x386   :  { %6131 = vmatmul.mubr.msk.f32.vlgmr.msra.gmra.mrb[2].mxu0 %vm327_vm2, %v6718_v48  ;;  %6138 = vmatprep.subr.mxu0 %v6574_v49 }
 0x387   :  { %6140 = vmatprep.mubr.msk.f32.mxu0 %vm6575_vm1, %v6574_v49 }
 0x39f   :  { %v6785_v25 = vpop.permute.xlu0 %1400 }
 0x407   :  { %v396_v62 = vpop.f32.mrb[0].mxu1 }
 0x408   :  { %v616_v63 = vmul.f32 0.35355338, %v396_v62  ;;  %v6117_v2 = vpop.f32.mrb[1].mxu1 }
 0x40a   :  { %v624_v3 = vadd.f32 %v6759_v61, %v616_v63 }
 0x40c   :  { %v628_v4 = vsel %vm327_vm2, %v624_v3, -inf }
 0x40d   :  { %629 = vmax.xlane.f32.xlu0 %v628_v4 }
 0x451   :  { %v468_v5 = vpop.f32.mrb[2].mxu1 }
 0x452   :  { %v617_v6 = vmul.f32 0.35355338, %v468_v5  ;;  %v6122_v7 = vpop.f32.mrb[3].mxu1 }
 0x454   :  { %v625_v8 = vadd.f32 %v6759_v61, %v617_v6 }
 0x455   :  { %v540_v9 = vpop.f32.mrb[4].mxu1 }
 0x456   :  { %v618_v10 = vmul.f32 0.35355338, %v540_v9  ;;  %v6127_v11 = vpop.f32.mrb[5].mxu1  ;;  %v631_v12 = vsel %vm327_vm2, %v625_v8, -inf }
 0x457   :  { %632 = vmax.xlane.f32.xlu1 %v631_v12 }
 0x458   :  { %v626_v13 = vadd.f32 %v6759_v61, %v618_v10 }
 0x459   :  { %v612_v14 = vpop.f32.mrb[2].mxu0 }
 0x45a   :  { %v619_v15 = vmul.f32 0.35355338, %v612_v14  ;;  %v6132_v16 = vpop.f32.mrb[3].mxu0  ;;  %v634_v17 = vsel %vm327_vm2, %v626_v13, -inf }
 0x45b   :  { %635 = vmax.xlane.f32.xlu1 %v634_v17 }
 0x45c   :  { %v627_v18 = vadd.f32 %v6759_v61, %v619_v15 }
 0x45e   :  { %v637_v19 = vsel %vm327_vm2, %v627_v18, -inf }
 0x45f   :  { %638 = vmax.xlane.f32.xlu0 %v637_v19 }
 0x46c   :  { %1402 = vrot.lane.b32.xlu1 %v6698_v43, %s6572_s20 }
 0x470   :  { %672 = vrot.lane.b32.xlu1 %v6700_v45, %s6577_s1 }
 0x474   :  { %674 = vrot.lane.b32.xlu1 %v6712_v47, %s6577_s1 }
 0x478   :  { %678 = vrot.lane.b32.xlu1 %v6718_v48, %s6577_s1 }
 0x47c   :  { %1406 = vrot.lane.b32.xlu1 %v6777_v20, %s6573_s21 }
 0x49a   :  { %v630_v27 = vpop.xlane.xlu0 %629 }
 0x49b   :  { %v640_v39 = vsub.f32 %v624_v3, %v630_v27 }
 0x49d   :  { %v644_v40 = vmul.f32 1.442695, %v640_v39 }
 0x4e4   :  { %v633_v21 = vpop.xlane.xlu1 %632 }
 0x4e5   :  { %v641_v29 = vsub.f32 %v625_v8, %v633_v21 }
 0x4e7   :  { %v646_v32 = vmul.f32 1.442695, %v641_v29  ;;  %v6847_v29 = vrot.slane %v6755_v60, %v6689_v30 }
 0x4e8   :  { %v636_v22 = vpop.xlane.xlu1 %635 }
 0x4e9   :  { %6465 = vpow2.f32 %v646_v32  ;;  %v642_v41 = vsub.f32 %v626_v13, %v636_v22 }
 0x4eb   :  { %v648_v42 = vmul.f32 1.442695, %v642_v41 }
 0x4ec   :  { %v6781_v23 = vpop.permute.xlu1 %1402  ;;  %v639_v31 = vpop.xlane.xlu0 %638 }
 0x4ed   :  { %1410 = vrot.lane.b32.xlu1 %v6781_v23, %s6573_s21  ;;  %v643_v33 = vsub.f32 %v627_v18, %v639_v31 }
 0x4ef   :  { %v650_v34 = vmul.f32 1.442695, %v643_v33 }
 0x4f0   :  { %v673_v24 = vpop.permute.xlu1 %672 }
 0x4f1   :  { %684 = vxpose.xlu0.b32.start.end [1/1] (short) (narrow) %v673_v24, 8  ;;  %6467 = vpow2.f32 %v650_v34 }
 0x4f2   :  { %6469 = vpow2.f32 %v644_v40 }
 0x4f3   :  { %v6466_v35 = vpop.eup %6465  ;;  %6471 = vpow2.f32 %v648_v42 }
 0x4f4   :  { %v655_v36 = vsel %vm327_vm2, %v6466_v35, 0.0 }
 0x4fb   :  { %v6468_v37 = vpop.eup %6467 }
 0x4fc   :  { %v661_v38 = vsel %vm327_vm2, %v6468_v37, 0.0  ;;  %v6470_v44 = vpop.eup %6469 }
 0x4fd   :  { %v652_v45 = vsel %vm327_vm2, %v6470_v44, 0.0  ;;  %v6472_v47 = vpop.eup %6471 }
 0x4fe   :  { %v658_v48 = vsel %vm327_vm2, %v6472_v47, 0.0 }
 0x511   :  { %656 = vadd.xlane.f32.xlu1 %v655_v36 }
 0x515   :  { %662 = vadd.xlane.f32.xlu1 %v661_v38 }
 0x51a   :  { %676 = vrot.lane.b32.xlu0 %v6710_v46, %s6577_s1  ;;  %v675_v46 = vpop.permute.xlu1 %674 }
 0x51e   :  { %1404 = vrot.lane.b32.xlu0 %v6698_v43, %s6573_s21  ;;  %v679_v52 = vpop.permute.xlu1 %678 }
 0x522   :  { %1408 = vrot.lane.b32.xlu0 %v6785_v25, %s6573_s21  ;;  %v1407_v55 = vpop.permute.xlu1 %1406 }
 0x541   :  { %653 = vadd.xlane.f32.xlu0 %v652_v45 }
 0x545   :  { %659 = vadd.xlane.f32.xlu0 %v658_v48 }
 0x548   :  { %716 = vxpose.xlu1.b32.start.end [1/1] (short) (narrow) %v675_v46, 8 }
 0x55f   :  { %v1411_v56 = vpop.permute.xlu1 %1410 }
 0x571   :  { %v700_v50 = vpop.trf.xlu0 }
 0x58c   :  { %v677_v51 = vpop.permute.xlu0 %676 }
 0x58d   :  { %748 = vxpose.xlu0.b32.start.end [1/1] (short) (narrow) %v677_v51, 8 }
 0x590   :  { %v1405_v53 = vpop.permute.xlu0 %1404 }
 0x591   :  { %780 = vxpose.xlu0.b32.start.end [1/1] (short) (narrow) %v679_v52, 8 }
 0x594   :  { %v1409_v54 = vpop.permute.xlu0 %1408 }
 0x595   :  { %1416 = vxpose.xlu0.b32.start.end [1/1] (short) (narrow) %v1405_v53, 8  ;;  %1480 = vxpose.xlu1.b32.start.end [1/1] (short) (narrow) %v1409_v54, 8 }
 0x599   :  { %1448 = vxpose.xlu0.b32.start.end [1/1] (short) (narrow) %v1407_v55, 8 }
 0x59d   :  { %1512 = vxpose.xlu0.b32.start.end [1/1] (short) (narrow) %v1411_v56, 8 }
 0x59e   :  { %v657_v57 = vpop.xlane.xlu1 %656 }
 0x59f   :  { %6473 = vrcp.f32 %v657_v57 }
 0x5a2   :  { %v663_v62 = vpop.xlane.xlu1 %662 }
 0x5a3   :  { %6475 = vrcp.f32 %v663_v62 }
 0x5a9   :  { %v6474_v58 = vpop.eup %6473 }
 0x5aa   :  { %v669_v59 = vmul.f32 %v6474_v58, %v6466_v35 }
 0x5ac   :  { %6139 = vmatpush3.xpose.msk.msra.mxu0 %vm327_vm2, %v669_v59 }
 0x5ad   :  { %6148 = vmatprep.subr.mxu0 %v6574_v49  ;;  %v6476_v63 = vpop.eup %6475 }
 0x5ae   :  { %v671_v3 = vmul.f32 %v6476_v63, %v6468_v37 }
 0x5c8   :  { %v732_v2 = vpop.trf.xlu1 }
 0x5c9   :  { %6141 = vmatmul.mubr.msk.f32.vlgmr.msra.gmra.mrb[4].mxu0 %vm327_vm2, %v732_v2 }
 0x5ca   :  { %6149 = vmatpush3.xpose.msk.msra.mxu0 %vm327_vm2, %v671_v3  ;;  %6150 = vmatprep.mubr.msk.f32.mxu0 %vm6575_vm1, %v6574_v49 }
 0x5cb   :  { %6158 = vmatprep.subr.mxu0 %v6574_v49 }
 0x5ce   :  { %v654_v4 = vpop.xlane.xlu0 %653 }
 0x5cf   :  { %6477 = vrcp.f32 %v654_v4 }
 0x5d2   :  { %v660_v5 = vpop.xlane.xlu0 %659 }
 0x5d3   :  { %6479 = vrcp.f32 %v660_v5 }
 0x5d9   :  { %v6478_v6 = vpop.eup %6477 }
 0x5da   :  { %v668_v7 = vmul.f32 %v6478_v6, %v6470_v44 }
 0x5dc   :  { %6134 = vmatpush3.xpose.msk.msra.mxu1 %vm327_vm2, %v668_v7 }
 0x5dd   :  { %v6480_v8 = vpop.eup %6479  ;;  %6143 = vmatprep.subr.mxu1 %v6574_v49 }
 0x5de   :  { %v670_v9 = vmul.f32 %v6480_v8, %v6472_v47 }
 0x5df   :  { %6136 = vmatmul.mubr.msk.f32.vlgmr.msra.gmra.mrb[6].mxu1 %vm327_vm2, %v700_v50 }
 0x5e0   :  { %6144 = vmatpush3.xpose.msk.msra.mxu1 %vm327_vm2, %v670_v9  ;;  %6145 = vmatprep.mubr.msk.f32.mxu1 %vm6575_vm1, %v6574_v49 }
 0x5e1   :  { %6153 = vmatprep.subr.mxu1 %v6574_v49 }
 0x60d   :  { %v764_v10 = vpop.trf.xlu0 }
 0x60e   :  { %6146 = vmatmul.mubr.msk.f32.vlgmr.msra.gmra.mrb[8].mxu1 %vm327_vm2, %v764_v10 }
 0x60f   :  { %6155 = vmatprep.mubr.msk.f32.mxu1 %vm6575_vm1, %v6574_v49 }
 0x611   :  { %v796_v11 = vpop.trf.xlu0 }
 0x612   :  { %6151 = vmatmul.mubr.msk.f32.vlgmr.msra.gmra.mrb[6].mxu0 %vm327_vm2, %v796_v11 }
 0x613   :  { %6160 = vmatprep.mubr.msk.f32.mxu0 %vm6575_vm1, %v6574_v49 }
 0x615   :  { %v1432_v12 = vpop.trf.xlu0  ;;  %v1496_v13 = vpop.trf.xlu1 }
 0x616   :  { %6154 = vmatpush3.msra.mxu1 %v1432_v12 }
 0x617   :  { %6156 = vmatmul.mubr.msk.f32.vlgmr.msra.gmra.mrb[10].mxu1 %vm327_vm2, %v6698_v43  ;;  %6163 = vmatprep.subr.mxu1 %v6574_v49 }
 0x618   :  { %6164 = vmatpush3.msra.mxu1 %v1496_v13  ;;  %6165 = vmatprep.mubr.msk.f32.mxu1 %vm6575_vm1, %v6574_v49 }
 0x619   :  { %v1464_v14 = vpop.trf.xlu0  ;;  %6173 = vmatprep.subr.mxu1 %v6574_v49 }
 0x61a   :  { %6159 = vmatpush3.msra.mxu0 %v1464_v14 }
 0x61b   :  { %6161 = vmatmul.mubr.msk.f32.vlgmr.msra.gmra.mrb[8].mxu0 %vm327_vm2, %v6777_v20  ;;  %6166 = vmatmul.mubr.msk.f32.vlgmr.msra.gmra.mrb[12].mxu1 %vm327_vm2, %v6785_v25 }
 0x61c   :  { %6168 = vmatprep.subr.mxu0 %v6574_v49  ;;  %6170 = vmatprep.mubr.msk.f32.mxu0 %vm6575_vm1, %v6574_v49 }
 0x61d   :  { %v1528_v15 = vpop.trf.xlu0  ;;  %6175 = vmatprep.mubr.msk.f32.mxu1 %vm6575_vm1, %v6574_v49 }
 0x61e   :  { %6169 = vmatpush3.msra.mxu0 %v1528_v15 }
 0x61f   :  { %6171 = vmatmul.mubr.msk.f32.vlgmr.msra.gmra.mrb[10].mxu0 %vm327_vm2, %v6781_v23  ;;  %6178 = vmatprep.subr.mxu0 %v6574_v49 }
 0x620   :  { %6180 = vmatprep.mubr.msk.f32.mxu0 %vm6575_vm1, %v6574_v49 }
 0x69c   :  { %v6837_v16 = vpop.f32.mrb[4].mxu0 }
 0x69d   :  { %v6142_v17 = vpop.f32.mrb[5].mxu0 }
 0x6b2   :  { %v6839_v18 = vpop.f32.mrb[6].mxu1 }
 0x6b3   :  { %v6137_v19 = vpop.f32.mrb[7].mxu1 }
 0x6e1   :  { %v6841_v21 = vpop.f32.mrb[8].mxu1 }
 0x6e2   :  { %v6147_v22 = vpop.f32.mrb[9].mxu1 }
 0x6e5   :  { %v6843_v24 = vpop.f32.mrb[6].mxu0 }
 0x6e6   :  { %v6152_v27 = vpop.f32.mrb[7].mxu0 }
 0x6ea   :  { %v1612_v31 = vpop.f32.mrb[10].mxu1 }
 0x6eb   :  { %v1832_v32 = vmul.f32 0.35355338, %v1612_v31  ;;  %v6157_v33 = vpop.f32.mrb[11].mxu1 }
 0x6ed   :  { %v1840_v34 = vadd.f32 %v6847_v29, %v1832_v32 }
 0x6ee   :  { %v1684_v35 = vpop.f32.mrb[8].mxu0  ;;  %v1756_v36 = vpop.f32.mrb[12].mxu1 }
 0x6ef   :  { %v1833_v37 = vmul.f32 0.35355338, %v1684_v35  ;;  %v1834_v38 = vmul.f32 0.35355338, %v1756_v36  ;;  %v6162_v39 = vpop.f32.mrb[9].mxu0  ;;  %v6167_v40 = vpop.f32.mrb[13].mxu1 }
 0x6f0   :  { %v1844_v41 = vsel %vm327_vm2, %v1840_v34, -inf  ;;  %v6578_v35 = vmov 1983009808  }
 0x6f1   :  { %1845 = vmax.xlane.f32.xlu1 %v1844_v41  ;;  %v1842_v42 = vadd.f32 %v6847_v29, %v1834_v38  ;;  %v1841_v44 = vadd.f32 %v6847_v29, %v1833_v37  ;;  %v1247_v36 = vunpack.c.l.s4 %v6578_v35 }
 0x6f2   :  { %v1828_v60 = vpop.f32.mrb[10].mxu0 }
 0x6f3   :  { %v1835_v45 = vmul.f32 0.35355338, %v1828_v60  ;;  %v6172_v47 = vpop.f32.mrb[11].mxu0  ;;  %v1850_v48 = vsel %vm327_vm2, %v1842_v42, -inf  ;;  %v1847_v46 = vsel %vm327_vm2, %v1841_v44, -inf  ;;  %v1248_v39 = vunpack.c.0.s8 %v1247_v36 }
 0x6f4   :  { %1848 = vmax.xlane.f32.xlu0 %v1847_v46 }
 0x6f5   :  { %1851 = vmax.xlane.f32.xlu1 %v1850_v48  ;;  %v1843_v50 = vadd.f32 %v6847_v29, %v1835_v45 }
 0x6f7   :  { %v1853_v51 = vsel %vm327_vm2, %v1843_v50, -inf }
 0x6f9   :  { %1854 = vmax.xlane.f32.xlu1 %v1853_v51 }
 0x70a   :  { %1890 = vrot.lane.b32.xlu1 %v6777_v20, %s6577_s1  ;;  %1888 = vrot.lane.b32.xlu0 %v6698_v43, %s6577_s1 }
 0x70e   :  { %1892 = vrot.lane.b32.xlu1 %v6785_v25, %s6577_s1 }
 0x712   :  { %1894 = vrot.lane.b32.xlu1 %v6781_v23, %s6577_s1 }
 0x77e   :  { %v1846_v52 = vpop.xlane.xlu1 %1845 }
 0x77f   :  { %v1856_v53 = vsub.f32 %v1840_v34, %v1846_v52 }
 0x781   :  { %v1860_v54 = vmul.f32 1.442695, %v1856_v53  ;;  %v1849_v55 = vpop.xlane.xlu0 %1848 }
 0x782   :  { %v1852_v56 = vpop.xlane.xlu1 %1851  ;;  %v1857_v57 = vsub.f32 %v1841_v44, %v1849_v55  ;;  %v6579_v44 = vmov 1934713408  }
 0x783   :  { %6481 = vpow2.f32 %v1860_v54  ;;  %v1858_v58 = vsub.f32 %v1842_v42, %v1852_v56  ;;  %v6888_v42 = vsub.s32 %v1248_v39, %v6680_v26  ;;  %v1279_v60 = vunpack.c.l.s4 %v6579_v44 }
 0x784   :  { %v1862_v59 = vmul.f32 1.442695, %v1857_v57 }
 0x785   :  { %v1864_v62 = vmul.f32 1.442695, %v1858_v58  ;;  %v1889_v9 = vpop.permute.xlu0 %1888  ;;  %v1280_v53 = vunpack.c.0.s8 %v1279_v60 }
 0x786   :  { %6483 = vpow2.f32 %v1862_v59  ;;  %v1855_v20 = vpop.xlane.xlu1 %1854 }
 0x787   :  { %6485 = vpow2.f32 %v1864_v62  ;;  %v1859_v43 = vsub.f32 %v1843_v50, %v1855_v20  ;;  %v6895_v20 = vsub.s32 %v1280_v53, %v6680_v26  ;;  %v2612_v53 = vld [vmem:[%s7403_s5 + $0x8] sm:$0xff] }
 0x789   :  { %v1866_v63 = vmul.f32 1.442695, %v1859_v43 }
 0x78a   :  { %v1891_v8 = vpop.permute.xlu1 %1890 }
 0x78b   :  { %6487 = vpow2.f32 %v1866_v63 }
 0x78d   :  { %v6482_v25 = vpop.eup %6481 }
 0x78e   :  { %v1868_v2 = vsel %vm327_vm2, %v6482_v25, 0.0  ;;  %v1893_v10 = vpop.permute.xlu1 %1892 }
 0x78f   :  { %1869 = vadd.xlane.f32.xlu0 %v1868_v2 }
 0x790   :  { %v6484_v23 = vpop.eup %6483 }
 0x791   :  { %v6486_v3 = vpop.eup %6485  ;;  %v1871_v4 = vsel %vm327_vm2, %v6484_v23, 0.0 }
 0x792   :  { %v1874_v5 = vsel %vm327_vm2, %v6486_v3, 0.0  ;;  %1872 = vadd.xlane.f32.xlu1 %v1871_v4  ;;  %v1895_v11 = vpop.permute.xlu1 %1894 }
 0x793   :  { %1875 = vadd.xlane.f32.xlu0 %v1874_v5 }
 0x795   :  { %v6488_v6 = vpop.eup %6487 }
 0x796   :  { %v1877_v7 = vsel %vm327_vm2, %v6488_v6, 0.0 }
 0x797   :  { %1878 = vadd.xlane.f32.xlu0 %v1877_v7 }
 0x7c4   :  { %1900 = vxpose.xlu0.b32.start.end [1/1] (short) (narrow) %v1889_v9, 8 }
 0x7c5   :  { %1932 = vxpose.xlu1.b32.start.end [1/1] (short) (narrow) %v1891_v8, 8 }
 0x7c8   :  { %1964 = vxpose.xlu0.b32.start.end [1/1] (short) (narrow) %v1893_v10, 8 }
 0x7c9   :  { %1116 = vxpose.xlu1.b32.start.end [1/1] (short) (narrow) %v6839_v18, 8 }
 0x7cc   :  { %1996 = vxpose.xlu0.b32.start.end [1/1] (short) (narrow) %v1895_v11, 8 }
 0x7cd   :  { %1180 = vxpose.xlu1.b32.start.end [1/1] (short) (narrow) %v6841_v21, 8 }
 0x7d0   :  { %1148 = vxpose.xlu0.b32.start.end [1/1] (short) (narrow) %v6837_v16, 8 }
 0x7d4   :  { %1212 = vxpose.xlu0.b32.start.end [1/1] (short) (narrow) %v6843_v24, 8 }
 0x81c   :  { %v1870_v12 = vpop.xlane.xlu0 %1869 }
 0x81d   :  { %6489 = vrcp.f32 %v1870_v12 }
 0x81f   :  { %v1873_v13 = vpop.xlane.xlu1 %1872 }
 0x820   :  { %6491 = vrcp.f32 %v1873_v13  ;;  %v1876_v18 = vpop.xlane.xlu0 %1875 }
 0x821   :  { %6493 = vrcp.f32 %v1876_v18 }
 0x824   :  { %v1879_v16 = vpop.xlane.xlu0 %1878 }
 0x825   :  { %6495 = vrcp.f32 %v1879_v16 }
 0x827   :  { %v6490_v14 = vpop.eup %6489 }
 0x828   :  { %v1884_v15 = vmul.f32 %v6490_v14, %v6482_v25 }
 0x82a   :  { %v6492_v17 = vpop.eup %6491  ;;  %6174 = vmatpush3.xpose.msk.msra.mxu1 %vm327_vm2, %v1884_v15 }
 0x82b   :  { %v1885_v19 = vmul.f32 %v6492_v17, %v6484_v23  ;;  %6183 = vmatprep.subr.mxu1 %v6574_v49  ;;  %v6494_v21 = vpop.eup %6493 }
 0x82c   :  { %v1886_v27 = vmul.f32 %v6494_v21, %v6486_v3 }
 0x82d   :  { %6179 = vmatpush3.xpose.msk.msra.mxu0 %vm327_vm2, %v1885_v19 }
 0x82e   :  { %6188 = vmatprep.subr.mxu0 %v6574_v49 }
 0x82f   :  { %v6496_v22 = vpop.eup %6495 }
 0x830   :  { %v1887_v32 = vmul.f32 %v6496_v22, %v6488_v6 }
 0x844   :  { %v1916_v24 = vpop.trf.xlu0 }
 0x845   :  { %6176 = vmatmul.mubr.msk.f32.vlgmr.msra.gmra.mrb[14].mxu1 %vm327_vm2, %v1916_v24  ;;  %v1948_v31 = vpop.trf.xlu1 }
 0x846   :  { %6184 = vmatpush3.xpose.msk.msra.mxu1 %vm327_vm2, %v1886_v27  ;;  %6181 = vmatmul.mubr.msk.f32.vlgmr.msra.gmra.mrb[12].mxu0 %vm327_vm2, %v1948_v31 }
 0x847   :  { %6189 = vmatpush3.xpose.msk.msra.mxu0 %vm327_vm2, %v1887_v32  ;;  %6185 = vmatprep.mubr.msk.f32.mxu1 %vm6575_vm1, %v6574_v49 }
 0x848   :  { %v1980_v33 = vpop.trf.xlu0  ;;  %6190 = vmatprep.mubr.msk.f32.mxu0 %vm6575_vm1, %v6574_v49 }
 0x849   :  { %6186 = vmatmul.mubr.msk.f32.vlgmr.msra.gmra.mrb[16].mxu1 %vm327_vm2, %v1980_v33  ;;  %v1132_v37 = vpop.trf.xlu1 }
 0x84c   :  { %v2012_v34 = vpop.trf.xlu0 }
 0x84d   :  { %6191 = vmatmul.mubr.msk.f32.vlgmr.msra.gmra.mrb[14].mxu0 %vm327_vm2, %v2012_v34  ;;  %v1196_v40 = vpop.trf.xlu1 }
 0x84e   :  { %v1244_v45 = vcombine.low %v1132_v37, %v1196_v40  ;;  %v1245_v47 = vcombine.high %v1132_v37, %v1196_v40 }
 0x850   :  { %v1164_v38 = vpop.trf.xlu0  ;;  %v1252_v55 = vrot.slane %v1244_v45, %v6888_v42  ;;  %v1259_v56 = vrot.slane %v1245_v47, %v6888_v42 }
 0x854   :  { %v1228_v41 = vpop.trf.xlu0 }
 0x855   :  { %v1260_v48 = vcombine.low %v1164_v38, %v1228_v41  ;;  %v1261_v46 = vcombine.high %v1164_v38, %v1228_v41 }
 0x857   :  { %v1268_v57 = vrot.slane %v1260_v48, %v6888_v42  ;;  %v1275_v58 = vrot.slane %v1261_v46, %v6888_v42 }
 0x859   :  { %v1276_v43 = vcombine.low %v1252_v55, %v1268_v57  ;;  %v1277_v63 = vcombine.high %v1252_v55, %v1268_v57  ;;  %v1292_v25 = vcombine.low %v1259_v56, %v1275_v58  ;;  %v1293_v2 = vcombine.high %v1259_v56, %v1275_v58 }
 0x85b   :  { %v1284_v4 = vrot.slane %v1276_v43, %v6895_v20  ;;  %v1291_v5 = vrot.slane %v1277_v63, %v6895_v20  ;;  %v1300_v6 = vrot.slane %v1292_v25, %v6895_v20  ;;  %v1307_v7 = vrot.slane %v1293_v2, %v6895_v20  ;;  %v2613_v25 = vld [vmem:[%s7403_s5 + $0x10] sm:$0xff]  ;;  %v2614_v2 = vld [vmem:[%s7403_s5 + $0x18] sm:$0xff] }
 0x85d   :  { %v1312_v8 = vcombine.low %v1284_v4, %v1291_v5  ;;  %v5892_v9 = vcombine.high %v1284_v4, %v1291_v5  ;;  %v1328_v10 = vcombine.low %v1300_v6, %v1307_v7  ;;  %v5893_v11 = vcombine.high %v1300_v6, %v1307_v7 }
 0x85f   :  { %v1319_v12 = vrot.slane %v1312_v8, %v6888_v42  ;;  %v1327_v13 = vrot.slane %v5892_v9, %v6888_v42  ;;  %v1335_v14 = vrot.slane %v1328_v10, %v6888_v42  ;;  %v1343_v15 = vrot.slane %v5893_v11, %v6888_v42 }
 0x861   :  { %v1344_v17 = vcombine.low %v1319_v12, %v1327_v13  ;;  %v1360_v19 = vcombine.low %v1335_v14, %v1343_v15  ;;  %v1345_v21 = vcombine.high %v1319_v12, %v1327_v13  ;;  %v1361_v22 = vcombine.high %v1335_v14, %v1343_v15 }
 0x863   :  { %v6906_v18 = vrot.slane %v1344_v17, %v6895_v20  ;;  %v6909_v16 = vrot.slane %v1360_v19, %v6895_v20  ;;  %v1359_v27 = vrot.slane %v1345_v21, %v6895_v20  ;;  %v1375_v31 = vrot.slane %v1361_v22, %v6895_v20 }
 0x865   :  { %v1377_v24 = vcombine.high %v6906_v18, %v6909_v16  ;;  %v1379_v32 = vcombine.high %v1359_v27, %v1375_v31  ;;  %v1378_v33 = vcombine.low %v1359_v27, %v1375_v31  ;;  %v1376_v22 = vcombine.low %v6906_v18, %v6909_v16 }
 0x918   :  { %v2100_v50 = vpop.f32.mrb[14].mxu1 }
 0x919   :  { %2332 = vxpose.xlu1.b32.start.end [1/1] (short) (narrow) %v2100_v50, 8  ;;  %v6177_v51 = vpop.f32.mrb[15].mxu1  ;;  %v2176_v52 = vpop.f32.mrb[12].mxu0 }
 0x91a   :  { %v6182_v54 = vpop.f32.mrb[13].mxu0  ;;  %2364 = vxpose.xlu0.b32.start.end [1/1] (short) (narrow) %v2176_v52, 8  ;;  %v2611_v52 = vld [vmem:[%s7403_s5] sm:$0xff] }
 0x91b   :  { %v6374_v54 = vpack.c.bf16 %v2612_v53, %v2611_v52 }
 0x91c   :  { %v2252_v59 = vpop.f32.mrb[16].mxu1 }
 0x91d   :  { %2396 = vxpose.xlu1.b32.start.end [1/1] (short) (narrow) %v2252_v59, 8  ;;  %v6187_v62 = vpop.f32.mrb[17].mxu1  ;;  %6375 = vmatprep.subr.bf16.mxu0 %v6374_v54 }
 0x91e   :  { %6377 = vmatpush3.bf16.msra.mxu0 %v6374_v54 }
 0x920   :  { %v2328_v23 = vpop.f32.mrb[14].mxu0 }
 0x921   :  { %2428 = vxpose.xlu0.b32.start.end [1/1] (short) (narrow) %v2328_v23, 8  ;;  %v6192_v3 = vpop.f32.mrb[15].mxu0  ;;  %v6378_v23 = vpack.c.bf16 %v2614_v2, %v2613_v25  ;;  %v2837_v2 = vld [vmem:[%s7407_s9] sm:$0xff] }
 0x923   :  { %6379 = vmatprep.subr.bf16.mxu0 %v6378_v23 }
 0x924   :  { %6381 = vmatpush3.bf16.msra.mxu0 %v6378_v23  ;;  %v2838_v23 = vld [vmem:[%s7407_s9 + $0x8] sm:$0xff] }
 0x93b   :  { %1381 = vrot.lane.b32.xlu1 %v1377_v24, %s6580_s24 }
 0x93f   :  { %1389 = vrot.lane.b32.xlu1 %v1379_v32, %s6581_s0 }
 0x94a   :  { %1385 = vrot.lane.b32.xlu0 %v1378_v33, %s6582_s25 }
 0x999   :  { %v2348_v34 = vpop.trf.xlu1 }
 0x99a   :  { %v2380_v35 = vpop.trf.xlu0 }
 0x99d   :  { %v2412_v36 = vpop.trf.xlu1 }
 0x99e   :  { %v2460_v37 = vcombine.low %v2348_v34, %v2412_v36  ;;  %v2461_v38 = vcombine.high %v2348_v34, %v2412_v36 }
 0x9a0   :  { %v2468_v44 = vrot.slane %v2460_v37, %v6888_v42  ;;  %v2475_v60 = vrot.slane %v2461_v38, %v6888_v42 }
 0x9a1   :  { %v2444_v39 = vpop.trf.xlu0 }
 0x9a2   :  { %v2476_v40 = vcombine.low %v2380_v35, %v2444_v39  ;;  %v2477_v41 = vcombine.high %v2380_v35, %v2444_v39  ;;  %v5908_v39 = vld [vmem:[%s7404_s6] ss:$0 sm:$0xff] }
 0x9a4   :  { %v2484_v45 = vrot.slane %v2476_v40, %v6888_v42  ;;  %v2491_v47 = vrot.slane %v2477_v41, %v6888_v42 }
 0x9a6   :  { %v2492_v48 = vcombine.low %v2468_v44, %v2484_v45  ;;  %v2493_v46 = vcombine.high %v2468_v44, %v2484_v45  ;;  %v2508_v50 = vcombine.low %v2475_v60, %v2491_v47  ;;  %v2509_v51 = vcombine.high %v2475_v60, %v2491_v47 }
 0x9a8   :  { %v2500_v55 = vrot.slane %v2492_v48, %v6895_v20  ;;  %v2507_v56 = vrot.slane %v2493_v46, %v6895_v20  ;;  %v2516_v57 = vrot.slane %v2508_v50, %v6895_v20  ;;  %v2523_v58 = vrot.slane %v2509_v51, %v6895_v20 }
 0x9aa   :  { %v2528_v59 = vcombine.low %v2500_v55, %v2507_v56  ;;  %v5906_v62 = vcombine.high %v2500_v55, %v2507_v56  ;;  %v2544_v43 = vcombine.low %v2516_v57, %v2523_v58  ;;  %v5907_v63 = vcombine.high %v2516_v57, %v2523_v58  ;;  %v2743_v58 = vld [vmem:[%s7405_s7] sm:$0xff] }
 0x9ac   :  { %v2535_v3 = vrot.slane %v2528_v59, %v6888_v42  ;;  %v2543_v4 = vrot.slane %v5906_v62, %v6888_v42  ;;  %v2551_v5 = vrot.slane %v2544_v43, %v6888_v42  ;;  %v2559_v6 = vrot.slane %v5907_v63, %v6888_v42  ;;  %v2744_v59 = vld [vmem:[%s7405_s7 + $0x8] sm:$0xff]  ;;  %v2745_v43 = vld [vmem:[%s7405_s7 + $0x10] sm:$0xff]  ;;  %v2746_v63 = vld [vmem:[%s7405_s7 + $0x18] sm:$0xff] }
 0x9ad   :  { %v1382_v21 = vpop.permute.xlu1 %1381  ;;  %v6382_v62 = vpack.c.bf16 %v2744_v59, %v2743_v58  ;;  %v6386_v25 = vpack.c.bf16 %v2746_v63, %v2745_v43 }
 0x9ae   :  { %v2560_v7 = vcombine.low %v2535_v3, %v2543_v4  ;;  %v2576_v8 = vcombine.low %v2551_v5, %v2559_v6  ;;  %v2561_v9 = vcombine.high %v2535_v3, %v2543_v4  ;;  %v2577_v10 = vcombine.high %v2551_v5, %v2559_v6  ;;  %v2839_v3 = vld [vmem:[%s7407_s9 + $0x10] sm:$0xff]  ;;  %v2840_v5 = vld [vmem:[%s7407_s9 + $0x18] sm:$0xff] }
 0x9af   :  { %v1392_v31 = vsel %vm327_vm2, %v1376_v22, %v1382_v21  ;;  %6383 = vmatprep.subr.bf16.mxu0 %v6382_v62  ;;  %v6390_v4 = vpack.c.bf16 %v2838_v23, %v2837_v2  ;;  %v6394_v6 = vpack.c.bf16 %v2840_v5, %v2839_v3  ;;  %v6545_v21 = vld [vmem:[%s7400_s2] sm:$0xf]  ;;  %v5919_v3 = vld [vmem:[%s7401_s3 + $0x28] sm:$0xff]  ;;  %v5920_v5 = vld [vmem:[%s7401_s3 + $0x30] sm:$0xff] }
 0x9b0   :  { %v2568_v11 = vrot.slane %v2560_v7, %v6895_v20  ;;  %v2584_v12 = vrot.slane %v2576_v8, %v6895_v20  ;;  %v2575_v14 = vrot.slane %v2561_v9, %v6895_v20  ;;  %v2591_v15 = vrot.slane %v2577_v10, %v6895_v20  ;;  %v2841_v7 = vld [vmem:[%s7407_s9 + $0x20] sm:$0xff]  ;;  %v2842_v8 = vld [vmem:[%s7407_s9 + $0x28] sm:$0xff] }
 0x9b1   :  { %v1390_v27 = vpop.permute.xlu1 %1389  ;;  %6391 = vmatprep.subr.bf16.mxu1 %v6390_v4  ;;  %v6398_v9 = vpack.c.bf16 %v2842_v8, %v2841_v7  ;;  %v5918_v23 = vld [vmem:[%s7401_s3 + $0x20] sm:$0xff] }
 0x9b2   :  { %v2593_v13 = vcombine.high %v2568_v11, %v2584_v12  ;;  %v2592_v17 = vcombine.low %v2568_v11, %v2584_v12  ;;  %v2594_v19 = vcombine.low %v2575_v14, %v2591_v15  ;;  %v2595_v24 = vcombine.high %v2575_v14, %v2591_v15  ;;  %6393 = vmatpush3.bf16.msra.mxu1 %v6390_v4 }
 0x9b3   :  { %6395 = vmatprep.subr.bf16.mxu1 %v6394_v6  ;;  %v6406_v4 = vpack.c.bf16 %v5919_v3, %v5918_v23 }
 0x9b4   :  { %2597 = vrot.lane.b32.xlu1 %v2593_v13, %s6580_s24 }
 0x9b6   :  { %6397 = vmatpush3.bf16.msra.mxu1 %v6394_v6  ;;  %v5921_v6 = vld [vmem:[%s7401_s3 + $0x38] sm:$0xff] }
 0x9b7   :  { %6399 = vmatprep.subr.bf16.mxu1 %v6398_v9  ;;  %v6410_v7 = vpack.c.bf16 %v5921_v6, %v5920_v5 }
 0x9b8   :  { %2601 = vrot.lane.b32.xlu1 %v2594_v19, %s6582_s25  ;;  %v2739_v19 = vsub.s32 3, %v6680_v26 }
 0x9ba   :  { %6401 = vmatpush3.bf16.msra.mxu1 %v6398_v9 }
 0x9bc   :  { %2605 = vrot.lane.b32.xlu1 %v2595_v24, %s6581_s0  ;;  %v1386_v32 = vpop.permute.xlu0 %1385 }
 0x9bd   :  { %v1394_v33 = vsel %vm1393_vm4, %v1392_v31, %v1386_v32  ;;  %v2740_v31 = vrot.slane %v6545_v21, %v2739_v19 }
 0x9be   :  { %v1396_v34 = vsel %vm1395_vm5, %v1394_v33, %v1390_v27 }
 0x9bf   :  { %6201 = vmatprep.mubr.msk.f32.mxu0 %vm48_vm0, %v1396_v34 }
 0xa26   :  { %v2598_v35 = vpop.permute.xlu1 %2597 }
 0xa27   :  { %v2608_v37 = vsel %vm327_vm2, %v2592_v17, %v2598_v35  ;;  %v2733_v17 = vsub.s32 2, %v6680_v26  ;;  %v5977_v26 = vld [vmem:[%s7407_s9 + $0x78] sm:$0xff] }
 0xa29   :  { %v2734_v22 = vrot.slane %v6545_v21, %v2733_v17 }
 0xa2a   :  { %v2602_v36 = vpop.permute.xlu1 %2601 }
 0xa2b   :  { %v2609_v18 = vsel %vm1393_vm4, %v2608_v37, %v2602_v36 }
 0xa2e   :  { %v2606_v16 = vpop.permute.xlu1 %2605 }
 0xa2f   :  { %v2610_v38 = vsel %vm1395_vm5, %v2609_v18, %v2606_v16  ;;  %v2843_v18 = vld [vmem:[%s7407_s9 + $0x30] sm:$0xff]  ;;  %v2844_v16 = vld [vmem:[%s7407_s9 + $0x38] sm:$0xff] }
 0xa30   :  { %6202 = vmatmul.mubr.msk.f32.vlgmr.msra.gmra.mrb[16].mxu0 %vm48_vm0, %v2610_v38  ;;  %v6402_v38 = vpack.c.bf16 %v2844_v16, %v2843_v18 }
 0xa31   :  { %6385 = vmatpush3.bf16.msra.mxu0 %v6382_v62 }
 0xa32   :  { %6387 = vmatprep.subr.bf16.mxu0 %v6386_v25  ;;  %6403 = vmatprep.subr.bf16.mxu1 %v6402_v38 }
 0xa33   :  { %6405 = vmatpush3.bf16.msra.mxu1 %v6402_v38 }
 0xa34   :  { %6255 = vmatprep.subr.mxu1 %v6574_v49 }
 0xa35   :  { %6389 = vmatpush3.bf16.msra.mxu0 %v6386_v25 }
 0xa36   :  { %6407 = vmatprep.subr.bf16.mxu0 %v6406_v4 }
 0xb03   :  { %v6203_v40 = vpop.f32.mrb[16].mxu0 }
 0xb04   :  { %v2700_v41 = vadd.f32 %v6203_v40, %v5908_v39  ;;  %v2694_v44 = vpop.f32.mrb[17].mxu0 }
 0xb05   :  { %v2695_v60 = vadd.f32 %v5908_v39, %v2694_v44  ;;  %v5911_v39 = vld [vmem:[%s7406_s8] ss:$0 sm:$0xff] }
 0xb06   :  { %v6963_v45 = vadd.f32 %v2700_v41, %v6658_v1 }
 0xb07   :  { %v6966_v47 = vadd.f32 %v2695_v60, %v6653_v0 }
 0xb08   :  { %v2708_v48 = vsel %vm48_vm0, %v6963_v45, 0.0 }
 0xb09   :  { %2709 = vadd.xlane.f32.xlu1 %v2708_v48  ;;  %v2705_v46 = vsel %vm48_vm0, %v6966_v47, 0.0 }
 0xb0a   :  { %2706 = vadd.xlane.f32.xlu0 %v2705_v46 }
 0xb96   :  { %v2710_v50 = vpop.xlane.xlu1 %2709 }
 0xb97   :  { %v2712_v51 = vmul.f32 0.03125, %v2710_v50  ;;  %v2707_v52 = vpop.xlane.xlu0 %2706  ;;  %v5914_v50 = vld [vmem:[%s7408_s10] ss:$0 sm:$0xff] }
 0xb98   :  { %v2711_v53 = vmul.f32 0.03125, %v2707_v52 }
 0xb99   :  { %v2714_v54 = vsub.f32 %v6963_v45, %v2712_v51 }
 0xb9a   :  { %v2713_v1 = vsub.f32 %v6966_v47, %v2711_v53 }
 0xb9b   :  { %v2716_v56 = vmul.f32 %v2714_v54, %v2714_v54 }
 0xb9c   :  { %v2715_v55 = vmul.f32 %v2713_v1, %v2713_v1 }
 0xb9d   :  { %v2720_v57 = vsel %vm48_vm0, %v2716_v56, 0.0 }
 0xb9e   :  { %v2717_v0 = vsel %vm48_vm0, %v2715_v55, 0.0 }
 0xb9f   :  { %2718 = vadd.xlane.f32.xlu0 %v2717_v0 }
 0xba3   :  { %2721 = vadd.xlane.f32.xlu0 %v2720_v57 }
 0xc2c   :  { %v2719_v10 = vpop.xlane.xlu0 %2718 }
 0xc2d   :  { %v2723_v11 = vmul.f32 0.03125, %v2719_v10 }
 0xc2f   :  { %v2725_v12 = vadd.f32 1e-06, %v2723_v11 }
 0xc30   :  { %v2722_v13 = vpop.xlane.xlu0 %2721 }
 0xc31   :  { %6497 = vrsqrt.f32 %v2725_v12  ;;  %v2724_v14 = vmul.f32 0.03125, %v2722_v13 }
 0xc33   :  { %v2726_v15 = vadd.f32 1e-06, %v2724_v14  ;;  %v7064_v14 = vld [vmem:[%s7400_s2 + $0x4] sm:$0xf] }
 0xc35   :  { %6499 = vrsqrt.f32 %v2726_v15  ;;  %v2967_v15 = vrot.slane %v7064_v14, %v6683_v28 }
 0xc3b   :  { %v6498_v24 = vpop.eup %6497 }
 0xc3c   :  { %v2729_v27 = vmul.f32 %v6498_v24, %v2713_v1 }
 0xc3e   :  { %v2735_v32 = vmul.f32 %v2734_v22, %v2729_v27 }
 0xc3f   :  { %v6500_v33 = vpop.eup %6499 }
 0xc40   :  { %v2730_v34 = vmul.f32 %v6500_v33, %v2714_v54  ;;  %v2741_v35 = vadd.f32 %v2740_v31, %v2735_v32 }
 0xc42   :  { %v2736_v36 = vmul.f32 %v2734_v22, %v2730_v34  ;;  %6212 = vmatprep.mubr.msk.f32.mxu0 %vm48_vm0, %v2741_v35 }
 0xc44   :  { %v2742_v37 = vadd.f32 %v2740_v31, %v2736_v36  ;;  %v2973_v31 = vrot.slane %v7064_v14, %v6689_v30  ;;  %v5923_v36 = vld [vmem:[%s7402_s4 + $0x1] ss:$0 sm:$0xff] }
 0xc46   :  { %6213 = vmatmul.mubr.msk.f32.vlgmr.msra.gmra.mrb[18].mxu0 %vm48_vm0, %v2742_v37 }
 0xc47   :  { %6409 = vmatpush3.bf16.msra.mxu0 %v6406_v4 }
 0xc48   :  { %6411 = vmatprep.subr.bf16.mxu0 %v6410_v7 }
 0xc4b   :  { %6413 = vmatpush3.bf16.msra.mxu0 %v6410_v7 }
 0xc4c   :  { %6245 = vmatprep.subr.mxu0 %v6574_v49 }
 0xd19   :  { %v6214_v40 = vpop.f32.mrb[18].mxu0 }
 0xd1a   :  { %v2832_v41 = vadd.f32 %v6214_v40, %v5911_v39  ;;  %v2826_v44 = vpop.f32.mrb[19].mxu0 }
 0xd1b   :  { %v2827_v60 = vadd.f32 %v5911_v39, %v2826_v44 }
 0xd1c   :  { %v2836_v46 = vmax.f32 %v2832_v41, 0.0 }
 0xd1d   :  { %v2835_v48 = vmax.f32 %v2827_v60, 0.0 }
 0xd1f   :  { %6231 = vmatprep.mubr.msk.f32.mxu1 %vm2852_vm6, %v2835_v48 }
 0xd20   :  { %6232 = vmatmul.mubr.msk.f32.vlgmr.msra.gmra.mrb[18].mxu1 %vm2852_vm6, %v2836_v46 }
 0xd21   :  { %6257 = vmatprep.mubr.msk.f32.mxu1 %vm6575_vm1, %v6574_v49 }
 0xdf3   :  { %v6233_v51 = vpop.f32.mrb[18].mxu1 }
 0xdf4   :  { %v2931_v52 = vadd.f32 %v6233_v51, %v5914_v50  ;;  %v2925_v53 = vpop.f32.mrb[19].mxu1 }
 0xdf5   :  { %v2926_v54 = vadd.f32 %v5914_v50, %v2925_v53 }
 0xdf6   :  { %v7035_v1 = vadd.f32 %v2931_v52, %v6963_v45 }
 0xdf7   :  { %v7038_v55 = vadd.f32 %v2926_v54, %v6966_v47 }
 0xdf8   :  { %v2941_v0 = vsel %vm48_vm0, %v7035_v1, 0.0 }
 0xdf9   :  { %2942 = vadd.xlane.f32.xlu1 %v2941_v0  ;;  %v2938_v56 = vsel %vm48_vm0, %v7038_v55, 0.0 }
 0xdfa   :  { %2939 = vadd.xlane.f32.xlu0 %v2938_v56 }
 0xe86   :  { %v2943_v57 = vpop.xlane.xlu1 %2942 }
 0xe87   :  { %v2945_v58 = vmul.f32 0.03125, %v2943_v57  ;;  %v2940_v59 = vpop.xlane.xlu0 %2939 }
 0xe88   :  { %v2944_v62 = vmul.f32 0.03125, %v2940_v59 }
 0xe89   :  { %v2947_v43 = vsub.f32 %v7035_v1, %v2945_v58 }
 0xe8a   :  { %v2946_v45 = vsub.f32 %v7038_v55, %v2944_v62 }
 0xe8b   :  { %v2949_v63 = vmul.f32 %v2947_v43, %v2947_v43 }
 0xe8c   :  { %v2948_v25 = vmul.f32 %v2946_v45, %v2946_v45 }
 0xe8d   :  { %v2953_v47 = vsel %vm48_vm0, %v2949_v63, 0.0 }
 0xe8e   :  { %2954 = vadd.xlane.f32.xlu1 %v2953_v47  ;;  %v2950_v2 = vsel %vm48_vm0, %v2948_v25, 0.0 }
 0xe8f   :  { %2951 = vadd.xlane.f32.xlu0 %v2950_v2 }
 0xf1b   :  { %v2955_v8 = vpop.xlane.xlu1 %2954 }
 0xf1c   :  { %v2957_v9 = vmul.f32 0.03125, %v2955_v8  ;;  %v2952_v10 = vpop.xlane.xlu0 %2951 }
 0xf1d   :  { %v2956_v11 = vmul.f32 0.03125, %v2952_v10 }
 0xf1e   :  { %v2959_v12 = vadd.f32 1e-06, %v2957_v9 }
 0xf1f   :  { %v2958_v13 = vadd.f32 1e-06, %v2956_v11 }
 0xf20   :  { %6501 = vrsqrt.f32 %v2959_v12 }
 0xf21   :  { %6503 = vrsqrt.f32 %v2958_v13 }
 0xf2a   :  { %v6502_v21 = vpop.eup %6501 }
 0xf2b   :  { %v6504_v22 = vpop.eup %6503  ;;  %v2963_v24 = vmul.f32 %v6502_v21, %v2947_v43 }
 0xf2c   :  { %v2962_v27 = vmul.f32 %v6504_v22, %v2946_v45 }
 0xf2d   :  { %v2969_v32 = vmul.f32 %v2967_v15, %v2963_v24 }
 0xf2e   :  { %v2968_v33 = vmul.f32 %v2967_v15, %v2962_v27 }
 0xf2f   :  { %v2975_v35 = vadd.f32 %v2973_v31, %v2969_v32 }
 0xf30   :  { %v2974_v34 = vadd.f32 %v2973_v31, %v2968_v33 }
 0xf32   :  { %6242 = vmatprep.mubr.msk.f32.mxu0 %vm48_vm0, %v2974_v34 }
 0xf33   :  { %6243 = vmatmul.mubr.msk.f32.vlgmr.msra.gmra.mrb[20].mxu0 %vm48_vm0, %v2975_v35 }
 0xf34   :  { %6247 = vmatprep.mubr.msk.f32.mxu0 %vm6575_vm1, %v6574_v49 }
0x1006   :  { %v6244_v37 = vpop.f32.mrb[20].mxu0 }
0x1007   :  { %v7077_v18 = vadd.f32 %v6244_v37, %v5923_v36  ;;  %v3061_v16 = vpop.f32.mrb[21].mxu0 }
0x1008   :  { %v7079_v38 = vadd.f32 %v5923_v36, %v3061_v16 }
0x100a   :  { %3073 = vrot.lane.b32.xlu1 %v7079_v38, %s6570_s18  ;;  %3071 = vrot.lane.b32.xlu0 %v7079_v38, %s6571_s19 }
0x100e   :  { %3075 = vrot.lane.b32.xlu1 %v7079_v38, %s6572_s20 }
0x1012   :  { %3077 = vrot.lane.b32.xlu1 %v7079_v38, %s6573_s21 }
0x107c   :  { %v7089_v39 = vpop.permute.xlu1 %3073  ;;  %v3072_v40 = vpop.permute.xlu0 %3071 }
0x107d   :  { %3081 = vrot.lane.b32.xlu1 %v7089_v39, %s6573_s21  ;;  %3079 = vrot.lane.b32.xlu0 %v3072_v40, %s6573_s21 }
0x1080   :  { %v3076_v41 = vpop.permute.xlu1 %3075 }
0x1081   :  { %3083 = vrot.lane.b32.xlu0 %v3076_v41, %s6573_s21 }
0x1084   :  { %v3078_v44 = vpop.permute.xlu1 %3077 }
0x10a6   :  { %3089 = vxpose.xlu1.b32.start.end [1/1] (short) (narrow) %v3078_v44, 8 }
0x10c4   :  { %4281 = vrot.lane.b32.xlu1 %v7077_v18, %s6571_s19 }
0x10ef   :  { %v3080_v60 = vpop.permute.xlu0 %3079  ;;  %v3082_v48 = vpop.permute.xlu1 %3081 }
0x10f0   :  { %3121 = vxpose.xlu0.b32.start.end [1/1] (short) (narrow) %v3080_v60, 8 }
0x10f3   :  { %v3084_v46 = vpop.permute.xlu0 %3083 }
0x10f4   :  { %3153 = vxpose.xlu0.b32.start.end [1/1] (short) (narrow) %v3082_v48, 8 }
0x10f8   :  { %3185 = vxpose.xlu0.b32.start.end [1/1] (short) (narrow) %v3084_v46, 8 }
0x1121   :  { %4283 = vrot.lane.b32.xlu0 %v7077_v18, %s6570_s18 }
0x1126   :  { %v3105_v50 = vpop.trf.xlu1 }
0x1127   :  { %6246 = vmatpush3.msra.mxu0 %v3105_v50 }
0x1128   :  { %6248 = vmatmul.mubr.msk.f32.vlgmr.msra.gmra.mrb[22].mxu0 %vm327_vm2, %v7079_v38  ;;  %6250 = vmatprep.subr.mxu0 %v6574_v49 }
0x1129   :  { %6252 = vmatprep.mubr.msk.f32.mxu0 %vm6575_vm1, %v6574_v49 }
0x1136   :  { %v7131_v9 = vpop.permute.xlu1 %4281 }
0x1170   :  { %v3137_v51 = vpop.trf.xlu0 }
0x1171   :  { %6251 = vmatpush3.msra.mxu0 %v3137_v51 }
0x1172   :  { %6253 = vmatmul.mubr.msk.f32.vlgmr.msra.gmra.mrb[24].mxu0 %vm327_vm2, %v3072_v40  ;;  %6260 = vmatprep.subr.mxu0 %v6574_v49 }
0x1173   :  { %6262 = vmatprep.mubr.msk.f32.mxu0 %vm6575_vm1, %v6574_v49 }
0x1174   :  { %v3169_v52 = vpop.trf.xlu0 }
0x1175   :  { %6256 = vmatpush3.msra.mxu1 %v3169_v52 }
0x1176   :  { %6258 = vmatmul.mubr.msk.f32.vlgmr.msra.gmra.mrb[20].mxu1 %vm327_vm2, %v7089_v39  ;;  %6265 = vmatprep.subr.mxu1 %v6574_v49 }
0x1177   :  { %6267 = vmatprep.mubr.msk.f32.mxu1 %vm6575_vm1, %v6574_v49 }
0x1178   :  { %v3201_v53 = vpop.trf.xlu0 }
0x1179   :  { %6261 = vmatpush3.msra.mxu0 %v3201_v53 }
0x117a   :  { %6263 = vmatmul.mubr.msk.f32.vlgmr.msra.gmra.mrb[26].mxu0 %vm327_vm2, %v3076_v41  ;;  %6270 = vmatprep.subr.mxu0 %v6574_v49 }
0x117b   :  { %6272 = vmatprep.mubr.msk.f32.mxu0 %vm6575_vm1, %v6574_v49 }
0x1193   :  { %v7139_v13 = vpop.permute.xlu0 %4283 }
0x11fb   :  { %v3285_v54 = vpop.f32.mrb[22].mxu0 }
0x11fc   :  { %v3505_v0 = vmul.f32 0.35355338, %v3285_v54  ;;  %v6249_v56 = vpop.f32.mrb[23].mxu0 }
0x11fe   :  { %v3509_v57 = vadd.f32 %v3505_v0, %v6759_v61 }
0x1200   :  { %v3513_v58 = vsel %vm327_vm2, %v3509_v57, -inf }
0x1201   :  { %3514 = vmax.xlane.f32.xlu0 %v3513_v58 }
0x1245   :  { %v3357_v59 = vpop.f32.mrb[24].mxu0 }
0x1246   :  { %v3506_v62 = vmul.f32 0.35355338, %v3357_v59  ;;  %v6254_v43 = vpop.f32.mrb[25].mxu0 }
0x1248   :  { %v3510_v45 = vadd.f32 %v3506_v62, %v6759_v61 }
0x1249   :  { %v3429_v63 = vpop.f32.mrb[20].mxu1 }
0x124a   :  { %v3507_v25 = vmul.f32 0.35355338, %v3429_v63  ;;  %v6259_v47 = vpop.f32.mrb[21].mxu1  ;;  %v3516_v2 = vsel %vm327_vm2, %v3510_v45, -inf }
0x124b   :  { %3517 = vmax.xlane.f32.xlu1 %v3516_v2 }
0x124c   :  { %v3511_v23 = vadd.f32 %v3507_v25, %v6759_v61 }
0x124d   :  { %v3501_v3 = vpop.f32.mrb[26].mxu0 }
0x124e   :  { %v3508_v4 = vmul.f32 0.35355338, %v3501_v3  ;;  %v6264_v5 = vpop.f32.mrb[27].mxu0  ;;  %v3519_v6 = vsel %vm327_vm2, %v3511_v23, -inf }
0x124f   :  { %3520 = vmax.xlane.f32.xlu1 %v3519_v6 }
0x1250   :  { %v3512_v7 = vadd.f32 %v3508_v4, %v6759_v61 }
0x1252   :  { %v3522_v8 = vsel %vm327_vm2, %v3512_v7, -inf }
0x1253   :  { %3523 = vmax.xlane.f32.xlu0 %v3522_v8 }
0x1260   :  { %4285 = vrot.lane.b32.xlu1 %v7077_v18, %s6572_s20 }
0x1264   :  { %3557 = vrot.lane.b32.xlu1 %v7079_v38, %s6577_s1 }
0x1268   :  { %3559 = vrot.lane.b32.xlu1 %v3072_v40, %s6577_s1 }
0x126c   :  { %3563 = vrot.lane.b32.xlu1 %v3076_v41, %s6577_s1 }
0x1270   :  { %4289 = vrot.lane.b32.xlu1 %v7131_v9, %s6573_s21 }
0x128e   :  { %v3515_v15 = vpop.xlane.xlu0 %3514 }
0x128f   :  { %v3525_v36 = vsub.f32 %v3509_v57, %v3515_v15 }
0x1291   :  { %v3529_v37 = vmul.f32 1.442695, %v3525_v36 }
0x12d8   :  { %v3518_v10 = vpop.xlane.xlu1 %3517 }
0x12d9   :  { %v3526_v21 = vsub.f32 %v3510_v45, %v3518_v10 }
0x12db   :  { %v3531_v24 = vmul.f32 1.442695, %v3526_v21 }
0x12dc   :  { %v3521_v61 = vpop.xlane.xlu1 %3520 }
0x12dd   :  { %6505 = vpow2.f32 %v3531_v24  ;;  %v3527_v16 = vsub.f32 %v3511_v23, %v3521_v61 }
0x12df   :  { %v3533_v38 = vmul.f32 1.442695, %v3527_v16 }
0x12e0   :  { %v7135_v11 = vpop.permute.xlu1 %4285  ;;  %v3524_v22 = vpop.xlane.xlu0 %3523 }
0x12e1   :  { %4293 = vrot.lane.b32.xlu1 %v7135_v11, %s6573_s21  ;;  %v3528_v27 = vsub.f32 %v3512_v7, %v3524_v22 }
0x12e3   :  { %v3535_v31 = vmul.f32 1.442695, %v3528_v27 }
0x12e4   :  { %v3558_v12 = vpop.permute.xlu1 %3557 }
0x12e5   :  { %3569 = vxpose.xlu0.b32.start.end [1/1] (short) (narrow) %v3558_v12, 8  ;;  %6507 = vpow2.f32 %v3535_v31 }
0x12e6   :  { %6509 = vpow2.f32 %v3529_v37 }
0x12e7   :  { %v6506_v32 = vpop.eup %6505  ;;  %6511 = vpow2.f32 %v3533_v38 }
0x12e8   :  { %v3540_v33 = vsel %vm327_vm2, %v6506_v32, 0.0 }
0x12ef   :  { %v6508_v34 = vpop.eup %6507 }
0x12f0   :  { %v3546_v35 = vsel %vm327_vm2, %v6508_v34, 0.0  ;;  %v6510_v40 = vpop.eup %6509 }
0x12f1   :  { %v3537_v41 = vsel %vm327_vm2, %v6510_v40, 0.0  ;;  %v6512_v44 = vpop.eup %6511 }
0x12f2   :  { %v3543_v60 = vsel %vm327_vm2, %v6512_v44, 0.0 }
0x1305   :  { %3541 = vadd.xlane.f32.xlu1 %v3540_v33 }
0x1309   :  { %3547 = vadd.xlane.f32.xlu1 %v3546_v35 }
0x130e   :  { %3561 = vrot.lane.b32.xlu0 %v7089_v39, %s6577_s1  ;;  %v3560_v39 = vpop.permute.xlu1 %3559 }
0x1312   :  { %4287 = vrot.lane.b32.xlu0 %v7077_v18, %s6573_s21  ;;  %v3564_v50 = vpop.permute.xlu1 %3563 }
0x1316   :  { %4291 = vrot.lane.b32.xlu0 %v7139_v13, %s6573_s21  ;;  %v4290_v53 = vpop.permute.xlu1 %4289 }
0x1335   :  { %3538 = vadd.xlane.f32.xlu0 %v3537_v41 }
0x1339   :  { %3544 = vadd.xlane.f32.xlu0 %v3543_v60 }
0x133c   :  { %3601 = vxpose.xlu1.b32.start.end [1/1] (short) (narrow) %v3560_v39, 8 }
0x1353   :  { %v4294_v54 = vpop.permute.xlu1 %4293 }
0x1365   :  { %v3585_v48 = vpop.trf.xlu0 }
0x1380   :  { %v3562_v46 = vpop.permute.xlu0 %3561 }
0x1381   :  { %3633 = vxpose.xlu0.b32.start.end [1/1] (short) (narrow) %v3562_v46, 8 }
0x1384   :  { %v4288_v51 = vpop.permute.xlu0 %4287 }
0x1385   :  { %3665 = vxpose.xlu0.b32.start.end [1/1] (short) (narrow) %v3564_v50, 8 }
0x1388   :  { %v4292_v52 = vpop.permute.xlu0 %4291 }
0x1389   :  { %4299 = vxpose.xlu0.b32.start.end [1/1] (short) (narrow) %v4288_v51, 8  ;;  %4363 = vxpose.xlu1.b32.start.end [1/1] (short) (narrow) %v4292_v52, 8 }
0x138d   :  { %4331 = vxpose.xlu0.b32.start.end [1/1] (short) (narrow) %v4290_v53, 8 }
0x1391   :  { %4395 = vxpose.xlu0.b32.start.end [1/1] (short) (narrow) %v4294_v54, 8 }
0x1392   :  { %v3542_v0 = vpop.xlane.xlu1 %3541 }
0x1393   :  { %6513 = vrcp.f32 %v3542_v0 }
0x1396   :  { %v3548_v58 = vpop.xlane.xlu1 %3547 }
0x1397   :  { %6515 = vrcp.f32 %v3548_v58 }
0x139d   :  { %v6514_v56 = vpop.eup %6513 }
0x139e   :  { %v3554_v57 = vmul.f32 %v6514_v56, %v6506_v32 }
0x13a0   :  { %6271 = vmatpush3.xpose.msk.msra.mxu0 %vm327_vm2, %v3554_v57 }
0x13a1   :  { %6280 = vmatprep.subr.mxu0 %v6574_v49  ;;  %v6516_v59 = vpop.eup %6515 }
0x13a2   :  { %v3556_v62 = vmul.f32 %v6516_v59, %v6508_v34 }
0x13bc   :  { %v3617_v43 = vpop.trf.xlu1 }
0x13bd   :  { %6273 = vmatmul.mubr.msk.f32.vlgmr.msra.gmra.mrb[28].mxu0 %vm327_vm2, %v3617_v43 }
0x13be   :  { %6281 = vmatpush3.xpose.msk.msra.mxu0 %vm327_vm2, %v3556_v62  ;;  %6282 = vmatprep.mubr.msk.f32.mxu0 %vm6575_vm1, %v6574_v49 }
0x13bf   :  { %6290 = vmatprep.subr.mxu0 %v6574_v49 }
0x13c2   :  { %v3539_v45 = vpop.xlane.xlu0 %3538 }
0x13c3   :  { %6517 = vrcp.f32 %v3539_v45 }
0x13c6   :  { %v3545_v63 = vpop.xlane.xlu0 %3544 }
0x13c7   :  { %6519 = vrcp.f32 %v3545_v63 }
0x13cd   :  { %v6518_v25 = vpop.eup %6517 }
0x13ce   :  { %v3553_v47 = vmul.f32 %v6518_v25, %v6510_v40 }
0x13d0   :  { %6266 = vmatpush3.xpose.msk.msra.mxu1 %vm327_vm2, %v3553_v47 }
0x13d1   :  { %v6520_v2 = vpop.eup %6519  ;;  %6275 = vmatprep.subr.mxu1 %v6574_v49 }
0x13d2   :  { %v3555_v23 = vmul.f32 %v6520_v2, %v6512_v44 }
0x13d3   :  { %6268 = vmatmul.mubr.msk.f32.vlgmr.msra.gmra.mrb[22].mxu1 %vm327_vm2, %v3585_v48 }
0x13d4   :  { %6276 = vmatpush3.xpose.msk.msra.mxu1 %vm327_vm2, %v3555_v23  ;;  %6277 = vmatprep.mubr.msk.f32.mxu1 %vm6575_vm1, %v6574_v49 }
0x13d5   :  { %6285 = vmatprep.subr.mxu1 %v6574_v49 }
0x1401   :  { %v3649_v3 = vpop.trf.xlu0 }
0x1402   :  { %6278 = vmatmul.mubr.msk.f32.vlgmr.msra.gmra.mrb[24].mxu1 %vm327_vm2, %v3649_v3 }
0x1403   :  { %6287 = vmatprep.mubr.msk.f32.mxu1 %vm6575_vm1, %v6574_v49 }
0x1405   :  { %v3681_v4 = vpop.trf.xlu0 }
0x1406   :  { %6283 = vmatmul.mubr.msk.f32.vlgmr.msra.gmra.mrb[30].mxu0 %vm327_vm2, %v3681_v4 }
0x1407   :  { %6292 = vmatprep.mubr.msk.f32.mxu0 %vm6575_vm1, %v6574_v49 }
0x1409   :  { %v4315_v5 = vpop.trf.xlu0  ;;  %v4379_v6 = vpop.trf.xlu1 }
0x140a   :  { %6286 = vmatpush3.msra.mxu1 %v4315_v5 }
0x140b   :  { %6288 = vmatmul.mubr.msk.f32.vlgmr.msra.gmra.mrb[26].mxu1 %vm327_vm2, %v7077_v18  ;;  %6295 = vmatprep.subr.mxu1 %v6574_v49 }
0x140c   :  { %6296 = vmatpush3.msra.mxu1 %v4379_v6  ;;  %6297 = vmatprep.mubr.msk.f32.mxu1 %vm6575_vm1, %v6574_v49 }
0x140d   :  { %v4347_v7 = vpop.trf.xlu0  ;;  %6305 = vmatprep.subr.mxu1 %v6574_v49 }
0x140e   :  { %6291 = vmatpush3.msra.mxu0 %v4347_v7 }
0x140f   :  { %6293 = vmatmul.mubr.msk.f32.vlgmr.msra.gmra.mrb[32].mxu0 %vm327_vm2, %v7131_v9  ;;  %6298 = vmatmul.mubr.msk.f32.vlgmr.msra.gmra.mrb[28].mxu1 %vm327_vm2, %v7139_v13 }
0x1410   :  { %6300 = vmatprep.subr.mxu0 %v6574_v49  ;;  %6302 = vmatprep.mubr.msk.f32.mxu0 %vm6575_vm1, %v6574_v49 }
0x1411   :  { %v4411_v8 = vpop.trf.xlu0  ;;  %6307 = vmatprep.mubr.msk.f32.mxu1 %vm6575_vm1, %v6574_v49 }
0x1412   :  { %6301 = vmatpush3.msra.mxu0 %v4411_v8 }
0x1413   :  { %6303 = vmatmul.mubr.msk.f32.vlgmr.msra.gmra.mrb[34].mxu0 %vm327_vm2, %v7135_v11  ;;  %6310 = vmatprep.subr.mxu0 %v6574_v49 }
0x1414   :  { %6312 = vmatprep.mubr.msk.f32.mxu0 %vm6575_vm1, %v6574_v49 }
0x1490   :  { %v7191_v10 = vpop.f32.mrb[28].mxu0 }
0x1491   :  { %v6274_v61 = vpop.f32.mrb[29].mxu0 }
0x14a6   :  { %v7193_v12 = vpop.f32.mrb[22].mxu1 }
0x14a7   :  { %v6269_v15 = vpop.f32.mrb[23].mxu1 }
0x14d5   :  { %v7195_v21 = vpop.f32.mrb[24].mxu1 }
0x14d6   :  { %v6279_v22 = vpop.f32.mrb[25].mxu1 }
0x14d9   :  { %v7197_v24 = vpop.f32.mrb[30].mxu0 }
0x14da   :  { %v6284_v27 = vpop.f32.mrb[31].mxu0 }
0x14de   :  { %v4495_v31 = vpop.f32.mrb[26].mxu1 }
0x14df   :  { %v4715_v32 = vmul.f32 0.35355338, %v4495_v31  ;;  %v6289_v33 = vpop.f32.mrb[27].mxu1 }
0x14e1   :  { %v4719_v34 = vadd.f32 %v4715_v32, %v6847_v29 }
0x14e2   :  { %v4567_v35 = vpop.f32.mrb[32].mxu0  ;;  %v4639_v36 = vpop.f32.mrb[28].mxu1 }
0x14e3   :  { %v4716_v37 = vmul.f32 0.35355338, %v4567_v35  ;;  %v4717_v16 = vmul.f32 0.35355338, %v4639_v36  ;;  %v6294_v38 = vpop.f32.mrb[33].mxu0  ;;  %v6299_v40 = vpop.f32.mrb[29].mxu1 }
0x14e4   :  { %v4723_v41 = vsel %vm327_vm2, %v4719_v34, -inf }
0x14e5   :  { %v4720_v44 = vadd.f32 %v4716_v37, %v6847_v29  ;;  %v4721_v60 = vadd.f32 %v4717_v16, %v6847_v29  ;;  %4724 = vmax.xlane.f32.xlu1 %v4723_v41 }
0x14e6   :  { %v4711_v39 = vpop.f32.mrb[34].mxu0 }
0x14e7   :  { %v4718_v48 = vmul.f32 0.35355338, %v4711_v39  ;;  %v6304_v46 = vpop.f32.mrb[35].mxu0  ;;  %v4729_v50 = vsel %vm327_vm2, %v4721_v60, -inf  ;;  %v4726_v51 = vsel %vm327_vm2, %v4720_v44, -inf }
0x14e8   :  { %4727 = vmax.xlane.f32.xlu0 %v4726_v51 }
0x14e9   :  { %v4722_v52 = vadd.f32 %v4718_v48, %v6847_v29  ;;  %4730 = vmax.xlane.f32.xlu1 %v4729_v50 }
0x14eb   :  { %v4732_v53 = vsel %vm327_vm2, %v4722_v52, -inf }
0x14ed   :  { %4733 = vmax.xlane.f32.xlu1 %v4732_v53 }
0x14fe   :  { %4769 = vrot.lane.b32.xlu1 %v7131_v9, %s6577_s1  ;;  %4767 = vrot.lane.b32.xlu0 %v7077_v18, %s6577_s1 }
0x1502   :  { %4771 = vrot.lane.b32.xlu1 %v7139_v13, %s6577_s1 }
0x1506   :  { %4773 = vrot.lane.b32.xlu1 %v7135_v11, %s6577_s1 }
0x1572   :  { %v4725_v54 = vpop.xlane.xlu1 %4724 }
0x1573   :  { %v4735_v0 = vsub.f32 %v4719_v34, %v4725_v54 }
0x1575   :  { %v4739_v56 = vmul.f32 1.442695, %v4735_v0  ;;  %v4728_v29 = vpop.xlane.xlu0 %4727 }
0x1576   :  { %v4731_v57 = vpop.xlane.xlu1 %4730  ;;  %v4736_v58 = vsub.f32 %v4720_v44, %v4728_v29 }
0x1577   :  { %6521 = vpow2.f32 %v4739_v56  ;;  %v4737_v59 = vsub.f32 %v4721_v60, %v4731_v57 }
0x1578   :  { %v4741_v62 = vmul.f32 1.442695, %v4736_v58 }
0x1579   :  { %v4743_v43 = vmul.f32 1.442695, %v4737_v59  ;;  %v4768_v5 = vpop.permute.xlu0 %4767 }
0x157a   :  { %6523 = vpow2.f32 %v4741_v62  ;;  %v4734_v9 = vpop.xlane.xlu1 %4733 }
0x157b   :  { %6525 = vpow2.f32 %v4743_v43  ;;  %v4738_v18 = vsub.f32 %v4722_v52, %v4734_v9 }
0x157d   :  { %v4745_v45 = vmul.f32 1.442695, %v4738_v18 }
0x157e   :  { %v4770_v4 = vpop.permute.xlu1 %4769 }
0x157f   :  { %6527 = vpow2.f32 %v4745_v45 }
0x1581   :  { %v6522_v13 = vpop.eup %6521 }
0x1582   :  { %v4747_v63 = vsel %vm327_vm2, %v6522_v13, 0.0  ;;  %v4772_v6 = vpop.permute.xlu1 %4771 }
0x1583   :  { %4748 = vadd.xlane.f32.xlu0 %v4747_v63 }
0x1584   :  { %v6524_v11 = vpop.eup %6523 }
0x1585   :  { %v6526_v25 = vpop.eup %6525  ;;  %v4750_v47 = vsel %vm327_vm2, %v6524_v11, 0.0 }
0x1586   :  { %v4753_v2 = vsel %vm327_vm2, %v6526_v25, 0.0  ;;  %4751 = vadd.xlane.f32.xlu1 %v4750_v47  ;;  %v4774_v7 = vpop.permute.xlu1 %4773 }
0x1587   :  { %4754 = vadd.xlane.f32.xlu0 %v4753_v2 }
0x1589   :  { %v6528_v23 = vpop.eup %6527 }
0x158a   :  { %v4756_v3 = vsel %vm327_vm2, %v6528_v23, 0.0 }
0x158b   :  { %4757 = vadd.xlane.f32.xlu0 %v4756_v3 }
0x15b8   :  { %4779 = vxpose.xlu0.b32.start.end [1/1] (short) (narrow) %v4768_v5, 8 }
0x15b9   :  { %4811 = vxpose.xlu1.b32.start.end [1/1] (short) (narrow) %v4770_v4, 8 }
0x15bc   :  { %4843 = vxpose.xlu0.b32.start.end [1/1] (short) (narrow) %v4772_v6, 8 }
0x15bd   :  { %4001 = vxpose.xlu1.b32.start.end [1/1] (short) (narrow) %v7193_v12, 8 }
0x15c0   :  { %4875 = vxpose.xlu0.b32.start.end [1/1] (short) (narrow) %v4774_v7, 8 }
0x15c1   :  { %4065 = vxpose.xlu1.b32.start.end [1/1] (short) (narrow) %v7195_v21, 8 }
0x15c4   :  { %4033 = vxpose.xlu0.b32.start.end [1/1] (short) (narrow) %v7191_v10, 8 }
0x15c8   :  { %4097 = vxpose.xlu0.b32.start.end [1/1] (short) (narrow) %v7197_v24, 8 }
0x1610   :  { %v4749_v8 = vpop.xlane.xlu0 %4748 }
0x1611   :  { %6529 = vrcp.f32 %v4749_v8 }
0x1613   :  { %v4752_v61 = vpop.xlane.xlu1 %4751 }
0x1614   :  { %6531 = vrcp.f32 %v4752_v61  ;;  %v4755_v12 = vpop.xlane.xlu0 %4754 }
0x1615   :  { %6533 = vrcp.f32 %v4755_v12 }
0x1618   :  { %v4758_v10 = vpop.xlane.xlu0 %4757 }
0x1619   :  { %6535 = vrcp.f32 %v4758_v10 }
0x161b   :  { %v6530_v15 = vpop.eup %6529 }
0x161c   :  { %v4763_v22 = vmul.f32 %v6530_v15, %v6522_v13 }
0x161e   :  { %v6532_v27 = vpop.eup %6531  ;;  %6306 = vmatpush3.xpose.msk.msra.mxu1 %vm327_vm2, %v4763_v22 }
0x161f   :  { %v4764_v31 = vmul.f32 %v6532_v27, %v6524_v11  ;;  %6315 = vmatprep.subr.mxu1 %v6574_v49  ;;  %v6534_v21 = vpop.eup %6533 }
0x1620   :  { %v4765_v32 = vmul.f32 %v6534_v21, %v6526_v25 }
0x1621   :  { %6311 = vmatpush3.xpose.msk.msra.mxu0 %vm327_vm2, %v4764_v31 }
0x1622   :  { %6320 = vmatprep.subr.mxu0 %v6574_v49 }
0x1623   :  { %v6536_v24 = vpop.eup %6535 }
0x1624   :  { %v4766_v34 = vmul.f32 %v6536_v24, %v6528_v23 }
0x1638   :  { %v4795_v33 = vpop.trf.xlu0 }
0x1639   :  { %6308 = vmatmul.mubr.msk.f32.vlgmr.msra.gmra.mrb[30].mxu1 %vm327_vm2, %v4795_v33  ;;  %v4827_v35 = vpop.trf.xlu1 }
0x163a   :  { %6316 = vmatpush3.xpose.msk.msra.mxu1 %vm327_vm2, %v4765_v32  ;;  %6313 = vmatmul.mubr.msk.f32.vlgmr.msra.gmra.mrb[36].mxu0 %vm327_vm2, %v4827_v35 }
0x163b   :  { %6321 = vmatpush3.xpose.msk.msra.mxu0 %vm327_vm2, %v4766_v34  ;;  %6317 = vmatprep.mubr.msk.f32.mxu1 %vm6575_vm1, %v6574_v49 }
0x163c   :  { %v4859_v36 = vpop.trf.xlu0  ;;  %6322 = vmatprep.mubr.msk.f32.mxu0 %vm6575_vm1, %v6574_v49 }
0x163d   :  { %6318 = vmatmul.mubr.msk.f32.vlgmr.msra.gmra.mrb[32].mxu1 %vm327_vm2, %v4859_v36  ;;  %v4017_v16 = vpop.trf.xlu1 }
0x1640   :  { %v4891_v37 = vpop.trf.xlu0 }
0x1641   :  { %6323 = vmatmul.mubr.msk.f32.vlgmr.msra.gmra.mrb[38].mxu0 %vm327_vm2, %v4891_v37  ;;  %v4081_v40 = vpop.trf.xlu1 }
0x1642   :  { %v4129_v44 = vcombine.low %v4017_v16, %v4081_v40  ;;  %v4130_v60 = vcombine.high %v4017_v16, %v4081_v40 }
0x1644   :  { %v4049_v38 = vpop.trf.xlu0  ;;  %v4137_v49 = vrot.slane %v4129_v44, %v6888_v42  ;;  %v4144_v53 = vrot.slane %v4130_v60, %v6888_v42 }
0x1648   :  { %v4113_v41 = vpop.trf.xlu0 }
0x1649   :  { %v4145_v39 = vcombine.low %v4049_v38, %v4113_v41  ;;  %v4146_v48 = vcombine.high %v4049_v38, %v4113_v41 }
0x164b   :  { %v4153_v54 = vrot.slane %v4145_v39, %v6888_v42  ;;  %v4160_v0 = vrot.slane %v4146_v48, %v6888_v42 }
0x164d   :  { %v4161_v57 = vcombine.low %v4137_v49, %v4153_v54  ;;  %v4162_v58 = vcombine.high %v4137_v49, %v4153_v54  ;;  %v4177_v59 = vcombine.low %v4144_v53, %v4160_v0  ;;  %v4178_v62 = vcombine.high %v4144_v53, %v4160_v0 }
0x164f   :  { %v4169_v18 = vrot.slane %v4161_v57, %v6895_v20  ;;  %v4176_v45 = vrot.slane %v4162_v58, %v6895_v20  ;;  %v4185_v13 = vrot.slane %v4177_v59, %v6895_v20  ;;  %v4192_v63 = vrot.slane %v4178_v62, %v6895_v20  ;;  %v5956_v59 = vld [vmem:[%s7403_s5 + $0x30] sm:$0xff]  ;;  %v5957_v62 = vld [vmem:[%s7403_s5 + $0x38] sm:$0xff] }
0x1651   :  { %v4197_v11 = vcombine.low %v4169_v18, %v4176_v45  ;;  %v5938_v25 = vcombine.high %v4169_v18, %v4176_v45  ;;  %v4213_v47 = vcombine.low %v4185_v13, %v4192_v63  ;;  %v5939_v2 = vcombine.high %v4185_v13, %v4192_v63 }
0x1653   :  { %v4204_v23 = vrot.slane %v4197_v11, %v6888_v42  ;;  %v4212_v3 = vrot.slane %v5938_v25, %v6888_v42  ;;  %v4220_v4 = vrot.slane %v4213_v47, %v6888_v42  ;;  %v4228_v5 = vrot.slane %v5939_v2, %v6888_v42 }
0x1655   :  { %v4229_v6 = vcombine.low %v4204_v23, %v4212_v3  ;;  %v4245_v7 = vcombine.low %v4220_v4, %v4228_v5  ;;  %v4230_v15 = vcombine.high %v4204_v23, %v4212_v3  ;;  %v4246_v22 = vcombine.high %v4220_v4, %v4228_v5 }
0x1657   :  { %v7250_v8 = vrot.slane %v4229_v6, %v6895_v20  ;;  %v7253_v61 = vrot.slane %v4245_v7, %v6895_v20  ;;  %v4244_v31 = vrot.slane %v4230_v15, %v6895_v20  ;;  %v4260_v12 = vrot.slane %v4246_v22, %v6895_v20 }
0x1659   :  { %v4262_v27 = vcombine.high %v7250_v8, %v7253_v61  ;;  %v4264_v10 = vcombine.high %v4244_v31, %v4260_v12  ;;  %v4263_v21 = vcombine.low %v4244_v31, %v4260_v12  ;;  %v4261_v15 = vcombine.low %v7250_v8, %v7253_v61 }
0x170c   :  { %v4979_v46 = vpop.f32.mrb[30].mxu1 }
0x170d   :  { %5211 = vxpose.xlu1.b32.start.end [1/1] (short) (narrow) %v4979_v46, 8  ;;  %v6309_v50 = vpop.f32.mrb[31].mxu1  ;;  %v5055_v51 = vpop.f32.mrb[36].mxu0 }
0x170e   :  { %5243 = vxpose.xlu0.b32.start.end [1/1] (short) (narrow) %v5055_v51, 8  ;;  %v6314_v52 = vpop.f32.mrb[37].mxu0  ;;  %v5954_v50 = vld [vmem:[%s7403_s5 + $0x20] sm:$0xff]  ;;  %v5955_v51 = vld [vmem:[%s7403_s5 + $0x28] sm:$0xff] }
0x170f   :  { %v6414_v52 = vpack.c.bf16 %v5955_v51, %v5954_v50 }
0x1710   :  { %v5131_v56 = vpop.f32.mrb[32].mxu1 }
0x1711   :  { %5275 = vxpose.xlu1.b32.start.end [1/1] (short) (narrow) %v5131_v56, 8  ;;  %v6319_v29 = vpop.f32.mrb[33].mxu1  ;;  %6415 = vmatprep.subr.bf16.mxu1 %v6414_v52 }
0x1712   :  { %6417 = vmatpush3.bf16.msra.mxu1 %v6414_v52 }
0x1714   :  { %v5207_v43 = vpop.f32.mrb[38].mxu0 }
0x1715   :  { %5307 = vxpose.xlu0.b32.start.end [1/1] (short) (narrow) %v5207_v43, 8  ;;  %v6324_v9 = vpop.f32.mrb[39].mxu0  ;;  %v6418_v43 = vpack.c.bf16 %v5957_v62, %v5956_v59  ;;  %v5971_v59 = vld [vmem:[%s7407_s9 + $0x48] sm:$0xff]  ;;  %v5972_v62 = vld [vmem:[%s7407_s9 + $0x50] sm:$0xff] }
0x1717   :  { %6419 = vmatprep.subr.bf16.mxu1 %v6418_v43 }
0x1718   :  { %6421 = vmatpush3.bf16.msra.mxu1 %v6418_v43 }
0x172f   :  { %4266 = vrot.lane.b32.xlu1 %v4262_v27, %s6580_s24 }
0x1733   :  { %4274 = vrot.lane.b32.xlu1 %v4264_v10, %s6581_s0 }
0x173e   :  { %4270 = vrot.lane.b32.xlu0 %v4263_v21, %s6582_s25 }
0x178d   :  { %v5227_v24 = vpop.trf.xlu1 }
0x178e   :  { %v5259_v32 = vpop.trf.xlu0 }
0x1791   :  { %v5291_v33 = vpop.trf.xlu1 }
0x1792   :  { %v5339_v34 = vcombine.low %v5227_v24, %v5291_v33  ;;  %v5340_v35 = vcombine.high %v5227_v24, %v5291_v33 }
0x1794   :  { %v5347_v38 = vrot.slane %v5339_v34, %v6888_v42  ;;  %v5354_v40 = vrot.slane %v5340_v35, %v6888_v42  ;;  %v5959_v34 = vld [vmem:[%s7404_s6 + $0x1] ss:$0 sm:$0xff] }
0x1795   :  { %v5323_v36 = vpop.trf.xlu0 }
0x1796   :  { %v5355_v37 = vcombine.low %v5259_v32, %v5323_v36  ;;  %v5356_v16 = vcombine.high %v5259_v32, %v5323_v36 }
0x1798   :  { %v5363_v41 = vrot.slane %v5355_v37, %v6888_v42  ;;  %v5370_v44 = vrot.slane %v5356_v16, %v6888_v42 }
0x179a   :  { %v5371_v60 = vcombine.low %v5347_v38, %v5363_v41  ;;  %v5372_v39 = vcombine.high %v5347_v38, %v5363_v41  ;;  %v5387_v48 = vcombine.low %v5354_v40, %v5370_v44  ;;  %v5388_v46 = vcombine.high %v5354_v40, %v5370_v44 }
0x179c   :  { %v5379_v49 = vrot.slane %v5371_v60, %v6895_v20  ;;  %v5386_v53 = vrot.slane %v5372_v39, %v6895_v20  ;;  %v5395_v54 = vrot.slane %v5387_v48, %v6895_v20  ;;  %v5402_v0 = vrot.slane %v5388_v46, %v6895_v20 }
0x179e   :  { %v5407_v56 = vcombine.low %v5379_v49, %v5386_v53  ;;  %v5952_v29 = vcombine.high %v5379_v49, %v5386_v53  ;;  %v5423_v57 = vcombine.low %v5395_v54, %v5402_v0  ;;  %v5953_v58 = vcombine.high %v5395_v54, %v5402_v0  ;;  %v5962_v53 = vld [vmem:[%s7405_s7 + $0x20] sm:$0xff]  ;;  %v5963_v54 = vld [vmem:[%s7405_s7 + $0x28] sm:$0xff] }
0x179f   :  { %v6422_v0 = vpack.c.bf16 %v5963_v54, %v5962_v53 }
0x17a0   :  { %v5414_v9 = vrot.slane %v5407_v56, %v6888_v42  ;;  %v5422_v18 = vrot.slane %v5952_v29, %v6888_v42  ;;  %v5430_v45 = vrot.slane %v5423_v57, %v6888_v42  ;;  %v5438_v13 = vrot.slane %v5953_v58, %v6888_v42  ;;  %v5964_v56 = vld [vmem:[%s7405_s7 + $0x30] sm:$0xff]  ;;  %v5965_v29 = vld [vmem:[%s7405_s7 + $0x38] sm:$0xff]  ;;  %v5970_v58 = vld [vmem:[%s7407_s9 + $0x40] sm:$0xff] }
0x17a1   :  { %v4267_v42 = vpop.permute.xlu1 %4266  ;;  %6423 = vmatprep.subr.bf16.mxu0 %v6422_v0  ;;  %v6426_v57 = vpack.c.bf16 %v5965_v29, %v5964_v56  ;;  %v6430_v43 = vpack.c.bf16 %v5971_v59, %v5970_v58  ;;  %v5820_v29 = vld [vmem:[%s7409_s11] sm:$0x3] }
0x17a2   :  { %v5439_v63 = vcombine.low %v5414_v9, %v5422_v18  ;;  %v5455_v11 = vcombine.low %v5430_v45, %v5438_v13  ;;  %v5440_v25 = vcombine.high %v5414_v9, %v5422_v18  ;;  %v5456_v47 = vcombine.high %v5430_v45, %v5438_v13  ;;  %6425 = vmatpush3.bf16.msra.mxu0 %v6422_v0  ;;  %v5973_v9 = vld [vmem:[%s7407_s9 + $0x58] sm:$0xff]  ;;  %v5974_v45 = vld [vmem:[%s7407_s9 + $0x60] sm:$0xff]  ;;  %v5975_v13 = vld [vmem:[%s7407_s9 + $0x68] sm:$0xff] }
0x17a3   :  { %v4277_v31 = vsel %vm327_vm2, %v4261_v15, %v4267_v42  ;;  %6427 = vmatprep.subr.bf16.mxu0 %v6426_v57  ;;  %v6434_v18 = vpack.c.bf16 %v5973_v9, %v5972_v62  ;;  %6431 = vmatprep.subr.bf16.mxu1 %v6430_v43 }
0x17a4   :  { %v5447_v2 = vrot.slane %v5439_v63, %v6895_v20  ;;  %v5463_v23 = vrot.slane %v5455_v11, %v6895_v20  ;;  %v5454_v4 = vrot.slane %v5440_v25, %v6895_v20  ;;  %v5470_v5 = vrot.slane %v5456_v47, %v6895_v20 }
0x17a5   :  { %v4275_v27 = vpop.permute.xlu1 %4274  ;;  %v6438_v63 = vpack.c.bf16 %v5975_v13, %v5974_v45 }
0x17a6   :  { %v5472_v3 = vcombine.high %v5447_v2, %v5463_v23  ;;  %v5471_v6 = vcombine.low %v5447_v2, %v5463_v23  ;;  %v5473_v7 = vcombine.low %v5454_v4, %v5470_v5  ;;  %v5474_v22 = vcombine.high %v5454_v4, %v5470_v5  ;;  %6429 = vmatpush3.bf16.msra.mxu0 %v6426_v57 }
0x17a7   :  { %v5615_v4 = vrot.slane %v7064_v14, %v2733_v17  ;;  %v5976_v17 = vld [vmem:[%s7407_s9 + $0x70] sm:$0xff]  ;;  %v5850_v57 = vrot.slane %v5820_v29, %v6683_v28 }
0x17a8   :  { %5476 = vrot.lane.b32.xlu1 %v5472_v3, %s6580_s24 }
0x17ac   :  { %5480 = vrot.lane.b32.xlu1 %v5473_v7, %s6582_s25  ;;  %v5621_v7 = vrot.slane %v7064_v14, %v2739_v19  ;;  %v5967_v19 = vld [vmem:[%s7406_s8 + $0x1] ss:$0 sm:$0xff] }
0x17b0   :  { %5484 = vrot.lane.b32.xlu1 %v5474_v22, %s6581_s0  ;;  %v4271_v12 = vpop.permute.xlu0 %4270 }
0x17b1   :  { %v4278_v10 = vsel %vm1393_vm4, %v4277_v31, %v4271_v12 }
0x17b2   :  { %v4279_v20 = vsel %vm1395_vm5, %v4278_v10, %v4275_v27  ;;  %v6442_v10 = vpack.c.bf16 %v5977_v26, %v5976_v17 }
0x17b3   :  { %6333 = vmatprep.mubr.msk.f32.mxu1 %vm48_vm0, %v4279_v20 }
0x181a   :  { %v5477_v21 = vpop.permute.xlu1 %5476 }
0x181b   :  { %v5487_v32 = vsel %vm327_vm2, %v5471_v6, %v5477_v21 }
0x181e   :  { %v5481_v24 = vpop.permute.xlu1 %5480 }
0x181f   :  { %v5488_v33 = vsel %vm1393_vm4, %v5487_v32, %v5481_v24 }
0x1822   :  { %v5485_v8 = vpop.permute.xlu1 %5484 }
0x1823   :  { %v5489_v61 = vsel %vm1395_vm5, %v5488_v33, %v5485_v8  ;;  %v5979_v8 = vld [vmem:[%s7408_s10 + $0x1] ss:$0 sm:$0xff]  ;;  %s6583_s10 = smov [#allocation2]  }
0x1824   :  { %6334 = vmatmul.mubr.msk.f32.vlgmr.msra.gmra.mrb[34].mxu1 %vm48_vm0, %v5489_v61  ;;  %s5866_s13 = sshll.u32 %s6583_s10, 4  ;;  %s5867_s13 = int_to_ptr.vmem [resolvable:$true] %s5866_s13 }
0x1825   :  { %6433 = vmatpush3.bf16.msra.mxu1 %v6430_v43  ;;  %v5856_v43 = vrot.slane %v5820_v29, %v6689_v30  ;;  %s6546_s11 = scalar_lea.vmem %s5867_s13, 256  ;;  %p6551_p1 = scmp.lt.s32.totalorder %s5867_s13, %s5867_s13 }
0x1826   :  { %6435 = vmatprep.subr.bf16.mxu1 %v6434_v18  ;;  %p6547_p0 = scmp.ne.s32.totalorder %s5867_s13, %s6546_s11  ;;  %p6552_p2 = scmp.lt.s32.totalorder %s6546_s11, %s6546_s11 }
0x1828   :  { %p6553_p3 = por %p6552_p2, %p6551_p1 }
0x1829   :  { %6437 = vmatpush3.bf16.msra.mxu1 %v6434_v18 }
0x182a   :  { %6439 = vmatprep.subr.bf16.mxu1 %v6438_v63  ;;  %p6554_p4 = pnand %p6553_p3, %p6547_p0 }
0x182d   :  { %6441 = vmatpush3.bf16.msra.mxu1 %v6438_v63 }
0x182e   :  { %6443 = vmatprep.subr.bf16.mxu1 %v6442_v10 }
0x1831   :  { %6445 = vmatpush3.bf16.msra.mxu1 %v6442_v10 }
0x18f7   :  { %v6335_v35 = vpop.f32.mrb[34].mxu1 }
0x18f8   :  { %v5581_v36 = vadd.f32 %v6335_v35, %v5959_v34  ;;  %v5575_v37 = vpop.f32.mrb[35].mxu1 }
0x18f9   :  { %v5576_v16 = vadd.f32 %v5959_v34, %v5575_v37 }
0x18fa   :  { %v7307_v38 = vadd.f32 %v5581_v36, %v7035_v1 }
0x18fb   :  { %v7310_v40 = vadd.f32 %v5576_v16, %v7038_v55 }
0x18fc   :  { %v5589_v41 = vsel %vm48_vm0, %v7307_v38, 0.0 }
0x18fd   :  { %5590 = vadd.xlane.f32.xlu1 %v5589_v41  ;;  %v5586_v44 = vsel %vm48_vm0, %v7310_v40, 0.0 }
0x18fe   :  { %5587 = vadd.xlane.f32.xlu0 %v5586_v44 }
0x198a   :  { %v5591_v60 = vpop.xlane.xlu1 %5590 }
0x198b   :  { %v5593_v39 = vmul.f32 0.03125, %v5591_v60  ;;  %v5588_v48 = vpop.xlane.xlu0 %5587 }
0x198c   :  { %v5592_v46 = vmul.f32 0.03125, %v5588_v48 }
0x198d   :  { %v5595_v50 = vsub.f32 %v7307_v38, %v5593_v39 }
0x198e   :  { %v5594_v1 = vsub.f32 %v7310_v40, %v5592_v46 }
0x198f   :  { %v5597_v52 = vmul.f32 %v5595_v50, %v5595_v50 }
0x1990   :  { %v5596_v51 = vmul.f32 %v5594_v1, %v5594_v1 }
0x1991   :  { %v5601_v49 = vsel %vm48_vm0, %v5597_v52, 0.0 }
0x1992   :  { %v5598_v55 = vsel %vm48_vm0, %v5596_v51, 0.0 }
0x1993   :  { %5599 = vadd.xlane.f32.xlu0 %v5598_v55 }
0x1997   :  { %5602 = vadd.xlane.f32.xlu0 %v5601_v49 }
0x1a20   :  { %v5600_v11 = vpop.xlane.xlu0 %5599 }
0x1a21   :  { %v5604_v25 = vmul.f32 0.03125, %v5600_v11 }
0x1a23   :  { %v5606_v47 = vadd.f32 1e-06, %v5604_v25 }
0x1a24   :  { %v5603_v2 = vpop.xlane.xlu0 %5602 }
0x1a25   :  { %6537 = vrsqrt.f32 %v5606_v47  ;;  %v5605_v23 = vmul.f32 0.03125, %v5603_v2 }
0x1a27   :  { %v5607_v3 = vadd.f32 1e-06, %v5605_v23 }
0x1a29   :  { %6539 = vrsqrt.f32 %v5607_v3 }
0x1a2f   :  { %v6538_v5 = vpop.eup %6537 }
0x1a30   :  { %v5610_v6 = vmul.f32 %v6538_v5, %v5594_v1 }
0x1a32   :  { %v5616_v42 = vmul.f32 %v5615_v4, %v5610_v6 }
0x1a33   :  { %v6540_v15 = vpop.eup %6539 }
0x1a34   :  { %v5611_v22 = vmul.f32 %v6540_v15, %v5595_v50  ;;  %v5622_v27 = vadd.f32 %v5621_v7, %v5616_v42 }
0x1a36   :  { %v5617_v31 = vmul.f32 %v5615_v4, %v5611_v22  ;;  %6344 = vmatprep.mubr.msk.f32.mxu0 %vm48_vm0, %v5622_v27 }
0x1a38   :  { %v5623_v12 = vadd.f32 %v5621_v7, %v5617_v31 }
0x1a3a   :  { %6345 = vmatmul.mubr.msk.f32.vlgmr.msra.gmra.mrb[40].mxu0 %vm48_vm0, %v5623_v12 }
0x1b0d   :  { %v6346_v14 = vpop.f32.mrb[40].mxu0 }
0x1b0e   :  { %v5715_v20 = vadd.f32 %v6346_v14, %v5967_v19  ;;  %v5709_v21 = vpop.f32.mrb[41].mxu0 }
0x1b0f   :  { %v5710_v24 = vadd.f32 %v5967_v19, %v5709_v21 }
0x1b10   :  { %v5719_v33 = vmax.f32 %v5715_v20, 0.0 }
0x1b11   :  { %v5718_v32 = vmax.f32 %v5710_v24, 0.0 }
0x1b13   :  { %6363 = vmatprep.mubr.msk.f32.mxu1 %vm2852_vm6, %v5718_v32 }
0x1b14   :  { %6364 = vmatmul.mubr.msk.f32.vlgmr.msra.gmra.mrb[36].mxu1 %vm2852_vm6, %v5719_v33 }
0x1be7   :  { %v6365_v61 = vpop.f32.mrb[36].mxu1 }
0x1be8   :  { %v5815_v34 = vadd.f32 %v6365_v61, %v5979_v8  ;;  %v5809_v35 = vpop.f32.mrb[37].mxu1 }
0x1be9   :  { %v5810_v36 = vadd.f32 %v5979_v8, %v5809_v35 }
0x1bea   :  { %v5819_v37 = vadd.f32 %v5815_v34, %v7307_v38 }
0x1beb   :  { %v5818_v16 = vadd.f32 %v5810_v36, %v7310_v40 }
0x1bec   :  { %v5824_v41 = vsel %vm48_vm0, %v5819_v37, 0.0 }
0x1bed   :  { %5825 = vadd.xlane.f32.xlu1 %v5824_v41  ;;  %v5821_v44 = vsel %vm48_vm0, %v5818_v16, 0.0 }
0x1bee   :  { %5822 = vadd.xlane.f32.xlu0 %v5821_v44 }
0x1c7a   :  { %v5826_v60 = vpop.xlane.xlu1 %5825 }
0x1c7b   :  { %v5828_v39 = vmul.f32 0.03125, %v5826_v60  ;;  %v5823_v48 = vpop.xlane.xlu0 %5822 }
0x1c7c   :  { %v5827_v46 = vmul.f32 0.03125, %v5823_v48 }
0x1c7d   :  { %v5830_v50 = vsub.f32 %v5819_v37, %v5828_v39 }
0x1c7e   :  { %v5829_v1 = vsub.f32 %v5818_v16, %v5827_v46 }
0x1c7f   :  { %v5832_v51 = vmul.f32 %v5830_v50, %v5830_v50 }
0x1c80   :  { %v5831_v55 = vmul.f32 %v5829_v1, %v5829_v1 }
0x1c81   :  { %v5836_v52 = vsel %vm48_vm0, %v5832_v51, 0.0 }
0x1c82   :  { %5837 = vadd.xlane.f32.xlu1 %v5836_v52  ;;  %v5833_v38 = vsel %vm48_vm0, %v5831_v55, 0.0 }
0x1c83   :  { %5834 = vadd.xlane.f32.xlu0 %v5833_v38 }
0x1d0f   :  { %v5838_v40 = vpop.xlane.xlu1 %5837 }
0x1d10   :  { %v5840_v49 = vmul.f32 0.03125, %v5838_v40  ;;  %v5835_v53 = vpop.xlane.xlu0 %5834 }
0x1d11   :  { %v5839_v54 = vmul.f32 0.03125, %v5835_v53 }
0x1d12   :  { %v5842_v0 = vadd.f32 1e-06, %v5840_v49 }
0x1d13   :  { %v5841_v56 = vadd.f32 1e-06, %v5839_v54 }
0x1d14   :  { %6541 = vrsqrt.f32 %v5842_v0 }
0x1d15   :  { %6543 = vrsqrt.f32 %v5841_v56 }
0x1d1e   :  { %v6542_v58 = vpop.eup %6541 }
0x1d1f   :  { %v6544_v59 = vpop.eup %6543  ;;  %v5846_v62 = vmul.f32 %v6542_v58, %v5830_v50 }
0x1d20   :  { %v5845_v9 = vmul.f32 %v6544_v59, %v5829_v1 }
0x1d21   :  { %v5852_v18 = vmul.f32 %v5850_v57, %v5846_v62 }
0x1d22   :  { %v5851_v45 = vmul.f32 %v5850_v57, %v5845_v9 }
0x1d23   :  { %v5858_v13 = vadd.f32 %v5856_v43, %v5852_v18 }
0x1d24   :  { %v5857_v63 = vadd.f32 %v5856_v43, %v5851_v45 }
0x1d25   :  { %5860 = vst.msk [vmem:[#allocation2 + $0x8] sm:$0xff] %vm48_vm0, %v5858_v13 }
0x1d26   :  { %5859 = vst.msk [vmem:[#allocation2] sm:$0xff] %vm48_vm0, %v5857_v63 }
0x1d27   :  { %6557 = shalt.err (!%p6554_p4)
}
0x1d28   :  { %s6558_s16 = scalar_lea.hbm %s7410_s12, 256 }
0x1d29   :  { %p6559_p5 = scmp.ne.s32.totalorder %s7410_s12, %s6558_s16  ;;  %p6562_p6 = scmp.lt.u32.totalorder %s6558_s16, %s7410_s12 }
0x1d2b   :  { %p6564_p7 = pnand %p6562_p6, %p6559_p5 }
0x1d2d   :  { %6567 = shalt.err (!%p6564_p7)
}
0x1d2e   :  { %s6584_s27 = smov 128  }
0x1d2f   :  { %5872 = dma.vmem_to_hbm [thread:$0]  %s5867_s13, 256, %s7410_s12, [#allocation3], %s6584_s27, %s6584_s27, %s6580_s24  }
0x1d30   :  { %6568 = dma.done.wait [#allocation3], 256  }
0x1d31   :  { %6569 = vsyncadd [#allocation3], 4294967040 }
0x1d32   :  { %5876 = vsyncpa [#allocation3], 1 }

</bundles_post_ra>
